<compile_context>
chip_gen: v6e
topology: v6e:2x2x1
jax: 0.10.0
libtpu: 0.0.40
codegen_flags: <defaults>
</compile_context>

<pallas_src>
import functools
import math

import jax
import jax.numpy as jnp
import numpy as np
from jax.experimental import pallas as pl
from jax.experimental.pallas import tpu as pltpu


# ------------------------- shared math helpers (pure jnp) -------------------------
def _silu(x):
    return x * jax.nn.sigmoid(x)


def _layernorm_fused(x, eps=1e-5):
    # single-pass mean / mean-of-squares (halves cross-lane reduce traffic)
    mu = jnp.mean(x, axis=-1, keepdims=True)
    ex2 = jnp.mean(x * x, axis=-1, keepdims=True)
    var = ex2 - mu * mu
    return (x - mu) * jax.lax.rsqrt(var + eps)


def _layernorm_ref(x, eps=1e-5):
    mu = jnp.mean(x, axis=-1, keepdims=True)
    var = jnp.mean((x - mu) ** 2, axis=-1, keepdims=True)
    return (x - mu) * jax.lax.rsqrt(var + eps)


def _dense2(x, w1, b1, w2, b2, act):
    h = act(jnp.dot(x, w1, preferred_element_type=jnp.float32) + b1)
    return jnp.dot(h, w2, preferred_element_type=jnp.float32) + b2


def _round_up(x, m):
    return ((x + m - 1) // m) * m


# ------------------------------- Pallas kernel -------------------------------
# Bias slab row layout (row -> (tensor, true width)):
#   0 ti_b1(2H) 1 ti_b2(H) 2 ni_b1(2H) 3 ni_b2(H) 4 ge_b1(2H) 5 ge_b2(H)
#   6 te_b1(H)  7 te_b2(H) 8 ada_b(2H) 9 fl_b1(H) 10 fl_b2(out_pad)
def flow_npf_kernel(noisy_ref, truth_ref, mask_ref, glob_ref, t_ref, freqs_ref,
                    ti_w1_ref, ni_w1_ref, ge_w1_ref,
                    w_in2_ref,      # (3, 2H, H): [ti_w2, ni_w2, ge_w2]
                    te_w1s_ref,     # (2, F/2, H): [cos-half, sin-half] of te_w1
                    ada_w3_ref,     # (3, H, 2H): [truth, glob, time] row-blocks of ada_w
                    hh5_ref,        # (5, H, H): [te_w2, fl_w1_x, fl_w1_truth, fl_w1_glob, fl_w1_time]
                    fl_w2_ref,      # (H, out_pad), zero-padded columns
                    res_w_ref,      # (n_blocks, 3, H, H): [w1, w2, w3]
                    res_b_ref,      # (n_blocks, 4, H): [b1, b2, b3, gamma]
                    bias_ref,       # (11, BW) bias slab (lane-padded)
                    out_ref):       # (TB, out_pad)
    f32 = jnp.float32
    TB, N = mask_ref.shape
    H = w_in2_ref.shape[2]
    H2 = 2 * H
    noisy_dim = noisy_ref.shape[1]
    out_pad = out_ref.shape[1]
    n_blocks = res_w_ref.shape[0]

    def bias(idx, w):
        return bias_ref[idx:idx + 1, :][:, :w]

    def mm(a, b):
        return jnp.dot(a, b, preferred_element_type=f32)

    # --- truth_init (Linear->SiLU->Linear) + masked mean pooling -> truth_ctxt (TB, H) ---
    truth = truth_ref[...]                                   # (TB*N, Tin), pre-flattened in wrapper
    th = _silu(mm(truth, ti_w1_ref[...]) + bias(0, H2))
    te = (mm(th, w_in2_ref[0]) + bias(1, H)).reshape(TB, N, H)
    m = mask_ref[...]
    cnt = jnp.maximum(jnp.sum(m, axis=1, keepdims=True), 1e-6)   # guard empty rows
    truth_ctxt = jnp.sum(te * m[:, :, None], axis=1) / cnt

    # --- timestep embedding: sinusoidal -> Linear -> SiLU -> Linear (split-weight, no concat) ---
    args = t_ref[...] * freqs_ref[...]                       # (TB, F/2)
    tt = _silu(mm(jnp.cos(args), te_w1s_ref[0])
               + mm(jnp.sin(args), te_w1s_ref[1]) + bias(6, H))
    time_embd = mm(tt, hh5_ref[0]) + bias(7, H)

    # --- global embedding ---
    gh = _silu(mm(glob_ref[...], ge_w1_ref[...]) + bias(4, H2))
    glob_embd = mm(gh, w_in2_ref[2]) + bias(5, H)

    # --- adaLN modulation: silu(concat(ctxt)) @ ada_w == sum of split matmuls ---
    ada = (mm(_silu(truth_ctxt), ada_w3_ref[0])
           + mm(_silu(glob_embd), ada_w3_ref[1])
           + mm(_silu(time_embd), ada_w3_ref[2]) + bias(8, H2))
    shift_mlp = ada[:, :H]
    scale_mlp = ada[:, H:H2]

    # --- noisy init + modulation (K=1 matmul -> broadcast multiply on the VPU) ---
    if noisy_dim == 1:
        nh = noisy_ref[...] * ni_w1_ref[...]                 # (TB,1)*(1,2H) -> (TB,2H)
    else:
        nh = mm(noisy_ref[...], ni_w1_ref[...])
    nh = _silu(nh + bias(2, H2))
    x = mm(nh, w_in2_ref[1]) + bias(3, H)
    x = (1.0 + scale_mlp) * x + shift_mlp

    # --- resnet: BasicBlock = x = norm(x); x = x + LayerScale(Lin-ReLU-Lin-ReLU-Lin(x)) ---
    for i in range(n_blocks):
        rb = res_b_ref[i]                                    # (4, H)
        xn = _layernorm_fused(x)
        h1 = jax.nn.relu(mm(xn, res_w_ref[i, 0]) + rb[0:1])
        h2 = jax.nn.relu(mm(h1, res_w_ref[i, 1]) + rb[1:2])
        h3 = (mm(h2, res_w_ref[i, 2]) + rb[2:3]) * rb[3:4]
        x = xn + h3

    x = _layernorm_fused(x)

    # --- final layer: DenseNetwork on concat([x, ctxt]) done as split-weight sum ---
    fh = _silu(mm(x, hh5_ref[1]) + mm(truth_ctxt, hh5_ref[2])
               + mm(glob_embd, hh5_ref[3]) + mm(time_embd, hh5_ref[4]) + bias(9, H))
    # lane-dense (TB, out_pad) store; wrapper slices back to noisy_dim
    out_ref[...] = mm(fh, fl_w2_ref[...]) + bias(10, out_pad)


# --------------------------- parameter initialization ---------------------------
def init_params(key, H, Tin, G, noisy_dim, n_res_blocks, F):
    def lin(k, i, o, scale=0.1):
        kw, kb = jax.random.split(k)
        return (jax.random.normal(kw, (i, o), jnp.float32) * scale,
                jax.random.normal(kb, (1, o), jnp.float32) * 0.01)

    keys = jax.random.split(key, 16 + n_res_blocks)
    p = {}
    p["ti1"] = lin(keys[0], Tin, 2 * H)
    p["ti2"] = lin(keys[1], 2 * H, H)
    p["ni1"] = lin(keys[2], noisy_dim, 2 * H)
    p["ni2"] = lin(keys[3], 2 * H, H)
    p["ge1"] = lin(keys[4], G, 2 * H)
    p["ge2"] = lin(keys[5], 2 * H, H)
    p["te1"] = lin(keys[6], F, H)
    p["te2"] = lin(keys[7], H, H)
    p["ada"] = lin(keys[8], 3 * H, 2 * H)
    p["fl1"] = lin(keys[9], 4 * H, H)
    p["fl2"] = lin(keys[10], H, noisy_dim)
    blocks = []
    for i in range(n_res_blocks):
        kk = jax.random.split(keys[11 + i], 3)
        blocks.append(lin(kk[0], H, H) + lin(kk[1], H, H) + lin(kk[2], H, H)
                      + (1e-5 * jnp.ones((1, H), jnp.float32),))
    p["blocks"] = blocks
    return p


# ----------------------------------- wrapper -----------------------------------
def flow_npf_forward(params, noisy, truth, mask, gdat, t, freqs, n_res_blocks,
                     tile_b=256):
    B, N, Tin = truth.shape
    G = gdat.shape[1]
    H = params["ti2"][0].shape[1]
    noisy_dim = noisy.shape[1]
    F_half = freqs.shape[1]

    out_pad = _round_up(max(noisy_dim, 128), 128)
    BW = _round_up(max(2 * H, out_pad), 128)

    # --- batch tiling: TB rows per grid step (multiple of 8), pad B up to a multiple ---
    TB = _round_up(min(tile_b, B), 8)
    B_pad = _round_up(B, TB)
    grid = (B_pad // TB,)

    def pad_rows(a):
        if a.shape[0] == B_pad:
            return a
        return jnp.pad(a, ((0, B_pad - a.shape[0]),) + ((0, 0),) * (a.ndim - 1))

    noisy_p = pad_rows(noisy)
    truth_p = pad_rows(truth).reshape(B_pad * N, Tin)   # flatten on the host side
    mask_p = pad_rows(mask)
    gdat_p = pad_rows(gdat)
    t_p = pad_rows(t)

    # --- pack parameters into a few lane-dense slabs ---
    ti_w1, ti_b1 = params["ti1"]; ti_w2, ti_b2 = params["ti2"]
    ni_w1, ni_b1 = params["ni1"]; ni_w2, ni_b2 = params["ni2"]
    ge_w1, ge_b1 = params["ge1"]; ge_w2, ge_b2 = params["ge2"]
    te_w1, te_b1 = params["te1"]; te_w2, te_b2 = params["te2"]
    ada_w, ada_b = params["ada"]
    fl_w1, fl_b1 = params["fl1"]; fl_w2, fl_b2 = params["fl2"]

    w_in2 = jnp.stack([ti_w2, ni_w2, ge_w2], axis=0)                       # (3, 2H, H)
    te_w1s = jnp.stack([te_w1[:F_half], te_w1[F_half:]], axis=0)           # (2, F/2, H)
    ada_w3 = jnp.stack([ada_w[:H], ada_w[H:2 * H], ada_w[2 * H:]], axis=0)  # (3, H, 2H)
    hh5 = jnp.stack([te_w2, fl_w1[:H], fl_w1[H:2 * H],
                     fl_w1[2 * H:3 * H], fl_w1[3 * H:]], axis=0)           # (5, H, H)
    fl_w2p = jnp.pad(fl_w2, ((0, 0), (0, out_pad - fl_w2.shape[1])))       # (H, out_pad)

    res_w = jnp.stack([jnp.stack([blk[0], blk[2], blk[4]], axis=0)
                       for blk in params["blocks"]], axis=0)               # (nb, 3, H, H)
    res_b = jnp.stack([jnp.concatenate([blk[1], blk[3], blk[5], blk[6]], axis=0)
                       for blk in params["blocks"]], axis=0)               # (nb, 4, H)

    def padw(b):
        return jnp.pad(b, ((0, 0), (0, BW - b.shape[1])))
    bias_slab = jnp.concatenate(
        [padw(ti_b1), padw(ti_b2), padw(ni_b1), padw(ni_b2),
         padw(ge_b1), padw(ge_b2), padw(te_b1), padw(te_b2),
         padw(ada_b), padw(fl_b1), padw(fl_b2)], axis=0)                   # (11, BW)

    row2 = lambda i: (i, 0)
    zero2 = lambda i: (0, 0)
    zero3 = lambda i: (0, 0, 0)
    zero4 = lambda i: (0, 0, 0, 0)

    in_specs = [
        pl.BlockSpec((TB, noisy_dim), row2),          # noisy
        pl.BlockSpec((TB * N, Tin), row2),            # truth (flattened)
        pl.BlockSpec((TB, N), row2),                  # mask
        pl.BlockSpec((TB, G), row2),                  # global
        pl.BlockSpec((TB, 1), row2),                  # timestep
        pl.BlockSpec((1, F_half), zero2),             # freqs (resident)
        pl.BlockSpec(ti_w1.shape, zero2),             # weights: resident across grid steps
        pl.BlockSpec(ni_w1.shape, zero2),
        pl.BlockSpec(ge_w1.shape, zero2),
        pl.BlockSpec(w_in2.shape, zero3),
        pl.BlockSpec(te_w1s.shape, zero3),
        pl.BlockSpec(ada_w3.shape, zero3),
        pl.BlockSpec(hh5.shape, zero3),
        pl.BlockSpec(fl_w2p.shape, zero2),
        pl.BlockSpec(res_w.shape, zero4),
        pl.BlockSpec(res_b.shape, zero3),
        pl.BlockSpec(bias_slab.shape, zero2),
    ]
    out_specs = pl.BlockSpec((TB, out_pad), row2)

    out = pl.pallas_call(
        flow_npf_kernel,
        out_shape=jax.ShapeDtypeStruct((B_pad, out_pad), jnp.float32),
        grid=grid,
        in_specs=in_specs,
        out_specs=out_specs,
        compiler_params=pltpu.CompilerParams(
            dimension_semantics=("parallel",),        # lets v7x use both TCs; no-op on v5e/v6e
        ),
    )(noisy_p, truth_p, mask_p, gdat_p, t_p, freqs,
      ti_w1, ni_w1, ge_w1, w_in2, te_w1s, ada_w3, hh5, fl_w2p,
      res_w, res_b, bias_slab)

    return out[:B, :noisy_dim]


# --------------------------- pure-JAX reference (check) ---------------------------
def reference(params, noisy, truth, mask, gdat, t, freqs, n_res_blocks):
    B, N, Tin = truth.shape
    H = params["ti2"][0].shape[1]
    te = _dense2(truth.reshape(B * N, Tin), *params["ti1"], *params["ti2"], _silu)
    te = te.reshape(B, N, H)
    truth_ctxt = jnp.sum(te * mask[:, :, None], axis=1) / jnp.sum(mask, axis=1, keepdims=True)
    args = t * freqs
    t_freq = jnp.concatenate([jnp.cos(args), jnp.sin(args)], axis=-1)
    time_embd = _dense2(t_freq, *params["te1"], *params["te2"], _silu)
    glob_embd = _dense2(gdat, *params["ge1"], *params["ge2"], _silu)
    ctxt = jnp.concatenate([truth_ctxt, glob_embd, time_embd], axis=-1)
    ada = _silu(ctxt) @ params["ada"][0] + params["ada"][1]
    shift_mlp, scale_mlp = ada[:, :H], ada[:, H:]
    x = _dense2(noisy, *params["ni1"], *params["ni2"], _silu)
    x = (1.0 + scale_mlp) * x + shift_mlp
    for i in range(n_res_blocks):
        w1, b1, w2, b2, w3, b3, gamma = params["blocks"][i]
        xn = _layernorm_ref(x)
        h = jax.nn.relu(xn @ w1 + b1)
        h = jax.nn.relu(h @ w2 + b2)
        h = (h @ w3 + b3) * gamma
        x = xn + h
    x = _layernorm_ref(x)
    fin = jnp.concatenate([x, ctxt], axis=-1)
    h = _silu(fin @ params["fl1"][0] + params["fl1"][1])
    return h @ params["fl2"][0] + params["fl2"][1]


if __name__ == "__main__":
    # Small shapes consistent with the module:
    B, N = 2, 8                 # batch, number of truth particles
    H = 32                      # hidden_dim
    truth_vars = 4              # len(truth_variables)
    Tin = truth_vars + 4        # truth_in_dim
    G = 4                       # global_dim
    noisy_dim = 1
    n_res_blocks = 2
    F = 256                     # TimestepEmbedder frequency_embedding_size

    key = jax.random.PRNGKey(0)
    k_p, k_n, k_t, k_g, k_ts = jax.random.split(key, 5)

    params = init_params(k_p, H, Tin, G, noisy_dim, n_res_blocks, F)

    noisy = jax.random.normal(k_n, (B, noisy_dim), jnp.float32)
    truth = jax.random.normal(k_t, (B, N, Tin), jnp.float32)
    lengths = jnp.array([5, 8], dtype=jnp.int32)
    mask = (jnp.arange(N)[None, :] < lengths[:, None]).astype(jnp.float32)
    gdat = jax.random.normal(k_g, (B, G), jnp.float32)
    timestep = jax.random.uniform(k_ts, (B, 1), jnp.float32) * 1000.0
    half = F // 2
    freqs = jnp.exp(-jnp.log(10000.0) * jnp.arange(half, dtype=jnp.float32) / half)
    freqs = freqs.reshape(1, half)

    out = flow_npf_forward(params, noisy, truth, mask, gdat, timestep, freqs, n_res_blocks)
    out = jax.block_until_ready(out)

    ref = reference(params, noisy, truth, mask, gdat, timestep, freqs, n_res_blocks)
    ref = jax.block_until_ready(ref)

    assert out.shape == (B, noisy_dim)
    np.testing.assert_allclose(np.asarray(out), np.asarray(ref), rtol=1e-4, atol=1e-4)
    print("KERNEL_OK")
</pallas_src>

<mosaic_0001>
module attributes {stable_mosaic.version = 11 : i64} {
  func.func @flow_npf_kernel(%arg0: i32, %arg1: memref<8x1xf32, #tpu.memory_space<vmem>>, %arg2: memref<64x8xf32, #tpu.memory_space<vmem>>, %arg3: memref<8x8xf32, #tpu.memory_space<vmem>>, %arg4: memref<8x4xf32, #tpu.memory_space<vmem>>, %arg5: memref<8x1xf32, #tpu.memory_space<vmem>>, %arg6: memref<1x128xf32, #tpu.memory_space<vmem>>, %arg7: memref<8x64xf32, #tpu.memory_space<vmem>>, %arg8: memref<1x64xf32, #tpu.memory_space<vmem>>, %arg9: memref<4x64xf32, #tpu.memory_space<vmem>>, %arg10: memref<3x64x32xf32, #tpu.memory_space<vmem>>, %arg11: memref<2x128x32xf32, #tpu.memory_space<vmem>>, %arg12: memref<3x32x64xf32, #tpu.memory_space<vmem>>, %arg13: memref<5x32x32xf32, #tpu.memory_space<vmem>>, %arg14: memref<32x128xf32, #tpu.memory_space<vmem>>, %arg15: memref<2x3x32x32xf32, #tpu.memory_space<vmem>>, %arg16: memref<2x4x32xf32, #tpu.memory_space<vmem>>, %arg17: memref<11x128xf32, #tpu.memory_space<vmem>>, %arg18: memref<8x128xf32, #tpu.memory_space<vmem>>) attributes {dimension_semantics = [#tpu.dimension_semantics<parallel>], iteration_bounds = array<i64: 1>, scalar_prefetch = 0 : i64, scratch_operands = 0 : i64, tpu.core_type = #tpu.core_type<tc>, window_params = [{transform_indices = @transform_0, window_bounds = array<i64: 8, 1>}, {transform_indices = @transform_1, window_bounds = array<i64: 64, 8>}, {transform_indices = @transform_2, window_bounds = array<i64: 8, 8>}, {transform_indices = @transform_3, window_bounds = array<i64: 8, 4>}, {transform_indices = @transform_4, window_bounds = array<i64: 8, 1>}, {pipeline_mode = #tpu.pipeline_mode<synchronous>, transform_indices = @transform_5, window_bounds = array<i64: 1, 128>}, {pipeline_mode = #tpu.pipeline_mode<synchronous>, transform_indices = @transform_6, window_bounds = array<i64: 8, 64>}, {pipeline_mode = #tpu.pipeline_mode<synchronous>, transform_indices = @transform_7, window_bounds = array<i64: 1, 64>}, {pipeline_mode = #tpu.pipeline_mode<synchronous>, transform_indices = @transform_8, window_bounds = array<i64: 4, 64>}, {pipeline_mode = #tpu.pipeline_mode<synchronous>, transform_indices = @transform_9, window_bounds = array<i64: 3, 64, 32>}, {pipeline_mode = #tpu.pipeline_mode<synchronous>, transform_indices = @transform_10, window_bounds = array<i64: 2, 128, 32>}, {pipeline_mode = #tpu.pipeline_mode<synchronous>, transform_indices = @transform_11, window_bounds = array<i64: 3, 32, 64>}, {pipeline_mode = #tpu.pipeline_mode<synchronous>, transform_indices = @transform_12, window_bounds = array<i64: 5, 32, 32>}, {pipeline_mode = #tpu.pipeline_mode<synchronous>, transform_indices = @transform_13, window_bounds = array<i64: 32, 128>}, {pipeline_mode = #tpu.pipeline_mode<synchronous>, transform_indices = @transform_14, window_bounds = array<i64: 2, 3, 32, 32>}, {pipeline_mode = #tpu.pipeline_mode<synchronous>, transform_indices = @transform_15, window_bounds = array<i64: 2, 4, 32>}, {pipeline_mode = #tpu.pipeline_mode<synchronous>, transform_indices = @transform_16, window_bounds = array<i64: 11, 128>}, {transform_indices = @transform_17, window_bounds = array<i64: 8, 128>}]} {
    %c0 = arith.constant 0 : index
    %c0_0 = arith.constant 0 : index
    %0 = vector.load %arg2[%c0, %c0_0] : memref<64x8xf32, #tpu.memory_space<vmem>>, vector<64x8xf32>
    %c0_1 = arith.constant 0 : index
    %c0_2 = arith.constant 0 : index
    %1 = vector.load %arg7[%c0_1, %c0_2] : memref<8x64xf32, #tpu.memory_space<vmem>>, vector<8x64xf32>
    %cst = arith.constant dense<0.000000e+00> : vector<64x64xf32>
    %2 = tpu.matmul %0, %1, %cst {dimension_numbers = #tpu.dot_dimension_numbers<[1], [0], [0], [1], [0, 0, 1, 1], [], []>} : vector<64x8xf32>, vector<8x64xf32>, vector<64x64xf32> -> vector<64x64xf32>
    %c0_3 = arith.constant 0 : index
    %c0_4 = arith.constant 0 : index
    %3 = vector.load %arg17[%c0_3, %c0_4] : memref<11x128xf32, #tpu.memory_space<vmem>>, vector<1x128xf32>
    %4 = vector.extract_strided_slice %3 {offsets = [0, 0], sizes = [1, 64], strides = [1, 1]} : vector<1x128xf32> to vector<1x64xf32>
    %5 = vector.broadcast %4 : vector<1x64xf32> to vector<64x64xf32>
    %6 = arith.addf %2, %5 : vector<64x64xf32>
    %7 = arith.negf %6 : vector<64x64xf32>
    %8 = math.exp %7 : vector<64x64xf32>
    %cst_5 = arith.constant 1.000000e+00 : f32
    %9 = vector.broadcast %cst_5 : f32 to vector<64x64xf32>
    %10 = arith.addf %9, %8 : vector<64x64xf32>
    %11 = arith.divf %9, %10 : vector<64x64xf32>
    %12 = arith.mulf %6, %11 : vector<64x64xf32>
    %c0_6 = arith.constant 0 : index
    %c0_7 = arith.constant 0 : index
    %c0_8 = arith.constant 0 : index
    %13 = vector.load %arg10[%c0_6, %c0_7, %c0_8] : memref<3x64x32xf32, #tpu.memory_space<vmem>>, vector<1x64x32xf32>
    %14 = vector.shape_cast %13 : vector<1x64x32xf32> to vector<64x32xf32>
    %cst_9 = arith.constant dense<0.000000e+00> : vector<64x32xf32>
    %15 = tpu.matmul %12, %14, %cst_9 {dimension_numbers = #tpu.dot_dimension_numbers<[1], [0], [0], [1], [0, 0, 1, 1], [], []>} : vector<64x64xf32>, vector<64x32xf32>, vector<64x32xf32> -> vector<64x32xf32>
    %c1 = arith.constant 1 : index
    %c0_10 = arith.constant 0 : index
    %16 = vector.load %arg17[%c1, %c0_10] : memref<11x128xf32, #tpu.memory_space<vmem>>, vector<1x128xf32>
    %17 = vector.extract_strided_slice %16 {offsets = [0, 0], sizes = [1, 32], strides = [1, 1]} : vector<1x128xf32> to vector<1x32xf32>
    %18 = vector.broadcast %17 : vector<1x32xf32> to vector<64x32xf32>
    %19 = arith.addf %15, %18 : vector<64x32xf32>
    %20 = vector.shape_cast %19 : vector<64x32xf32> to vector<8x8x32xf32>
    %c0_11 = arith.constant 0 : index
    %c0_12 = arith.constant 0 : index
    %21 = vector.load %arg3[%c0_11, %c0_12] : memref<8x8xf32, #tpu.memory_space<vmem>>, vector<8x8xf32>
    %cst_13 = arith.constant dense<0.000000e+00> : vector<8xf32>
    %22 = vector.multi_reduction <add>, %21, %cst_13 [1] : vector<8x8xf32> to vector<8xf32>
    %23 = vector.shape_cast %22 : vector<8xf32> to vector<8x1xf32>
    %cst_14 = arith.constant 9.99999997E-7 : f32
    %24 = vector.broadcast %cst_14 : f32 to vector<8x1xf32>
    %25 = arith.maximumf %23, %24 : vector<8x1xf32>
    %26 = vector.shape_cast %21 : vector<8x8xf32> to vector<8x8x1xf32>
    %27 = vector.broadcast %26 : vector<8x8x1xf32> to vector<8x8x32xf32>
    %28 = arith.mulf %20, %27 : vector<8x8x32xf32>
    %cst_15 = arith.constant dense<0.000000e+00> : vector<8x32xf32>
    %29 = vector.multi_reduction <add>, %28, %cst_15 [1] : vector<8x8x32xf32> to vector<8x32xf32>
    %30 = vector.broadcast %25 : vector<8x1xf32> to vector<8x32xf32>
    %31 = arith.divf %29, %30 : vector<8x32xf32>
    %c0_16 = arith.constant 0 : index
    %c0_17 = arith.constant 0 : index
    %32 = vector.load %arg5[%c0_16, %c0_17] : memref<8x1xf32, #tpu.memory_space<vmem>>, vector<8x1xf32>
    %c0_18 = arith.constant 0 : index
    %c0_19 = arith.constant 0 : index
    %33 = vector.load %arg6[%c0_18, %c0_19] : memref<1x128xf32, #tpu.memory_space<vmem>>, vector<1x128xf32>
    %34 = vector.broadcast %32 : vector<8x1xf32> to vector<8x128xf32>
    %35 = vector.broadcast %33 : vector<1x128xf32> to vector<8x128xf32>
    %36 = arith.mulf %34, %35 : vector<8x128xf32>
    %37 = math.cos %36 : vector<8x128xf32>
    %c0_20 = arith.constant 0 : index
    %c0_21 = arith.constant 0 : index
    %c0_22 = arith.constant 0 : index
    %38 = vector.load %arg11[%c0_20, %c0_21, %c0_22] : memref<2x128x32xf32, #tpu.memory_space<vmem>>, vector<1x128x32xf32>
    %39 = vector.shape_cast %38 : vector<1x128x32xf32> to vector<128x32xf32>
    %cst_23 = arith.constant dense<0.000000e+00> : vector<8x32xf32>
    %40 = tpu.matmul %37, %39, %cst_23 {dimension_numbers = #tpu.dot_dimension_numbers<[1], [0], [0], [1], [0, 0, 1, 1], [], []>} : vector<8x128xf32>, vector<128x32xf32>, vector<8x32xf32> -> vector<8x32xf32>
    %41 = math.sin %36 : vector<8x128xf32>
    %c1_24 = arith.constant 1 : index
    %c0_25 = arith.constant 0 : index
    %c0_26 = arith.constant 0 : index
    %42 = vector.load %arg11[%c1_24, %c0_25, %c0_26] : memref<2x128x32xf32, #tpu.memory_space<vmem>>, vector<1x128x32xf32>
    %43 = vector.shape_cast %42 : vector<1x128x32xf32> to vector<128x32xf32>
    %cst_27 = arith.constant dense<0.000000e+00> : vector<8x32xf32>
    %44 = tpu.matmul %41, %43, %cst_27 {dimension_numbers = #tpu.dot_dimension_numbers<[1], [0], [0], [1], [0, 0, 1, 1], [], []>} : vector<8x128xf32>, vector<128x32xf32>, vector<8x32xf32> -> vector<8x32xf32>
    %45 = arith.addf %40, %44 : vector<8x32xf32>
    %c6 = arith.constant 6 : index
    %c0_28 = arith.constant 0 : index
    %46 = vector.load %arg17[%c6, %c0_28] : memref<11x128xf32, #tpu.memory_space<vmem>>, vector<1x128xf32>
    %47 = vector.extract_strided_slice %46 {offsets = [0, 0], sizes = [1, 32], strides = [1, 1]} : vector<1x128xf32> to vector<1x32xf32>
    %48 = vector.broadcast %47 : vector<1x32xf32> to vector<8x32xf32>
    %49 = arith.addf %45, %48 : vector<8x32xf32>
    %50 = arith.negf %49 : vector<8x32xf32>
    %51 = math.exp %50 : vector<8x32xf32>
    %cst_29 = arith.constant 1.000000e+00 : f32
    %52 = vector.broadcast %cst_29 : f32 to vector<8x32xf32>
    %53 = arith.addf %52, %51 : vector<8x32xf32>
    %54 = arith.divf %52, %53 : vector<8x32xf32>
    %55 = arith.mulf %49, %54 : vector<8x32xf32>
    %c0_30 = arith.constant 0 : index
    %c0_31 = arith.constant 0 : index
    %c0_32 = arith.constant 0 : index
    %56 = vector.load %arg13[%c0_30, %c0_31, %c0_32] : memref<5x32x32xf32, #tpu.memory_space<vmem>>, vector<1x32x32xf32>
    %57 = vector.shape_cast %56 : vector<1x32x32xf32> to vector<32x32xf32>
    %cst_33 = arith.constant dense<0.000000e+00> : vector<8x32xf32>
    %58 = tpu.matmul %55, %57, %cst_33 {dimension_numbers = #tpu.dot_dimension_numbers<[1], [0], [0], [1], [0, 0, 1, 1], [], []>} : vector<8x32xf32>, vector<32x32xf32>, vector<8x32xf32> -> vector<8x32xf32>
    %c7 = arith.constant 7 : index
    %c0_34 = arith.constant 0 : index
    %59 = vector.load %arg17[%c7, %c0_34] : memref<11x128xf32, #tpu.memory_space<vmem>>, vector<1x128xf32>
    %60 = vector.extract_strided_slice %59 {offsets = [0, 0], sizes = [1, 32], strides = [1, 1]} : vector<1x128xf32> to vector<1x32xf32>
    %61 = vector.broadcast %60 : vector<1x32xf32> to vector<8x32xf32>
    %62 = arith.addf %58, %61 : vector<8x32xf32>
    %c0_35 = arith.constant 0 : index
    %c0_36 = arith.constant 0 : index
    %63 = vector.load %arg4[%c0_35, %c0_36] : memref<8x4xf32, #tpu.memory_space<vmem>>, vector<8x4xf32>
    %c0_37 = arith.constant 0 : index
    %c0_38 = arith.constant 0 : index
    %64 = vector.load %arg9[%c0_37, %c0_38] : memref<4x64xf32, #tpu.memory_space<vmem>>, vector<4x64xf32>
    %cst_39 = arith.constant dense<0.000000e+00> : vector<8x64xf32>
    %65 = tpu.matmul %63, %64, %cst_39 {dimension_numbers = #tpu.dot_dimension_numbers<[1], [0], [0], [1], [0, 0, 1, 1], [], []>} : vector<8x4xf32>, vector<4x64xf32>, vector<8x64xf32> -> vector<8x64xf32>
    %c4 = arith.constant 4 : index
    %c0_40 = arith.constant 0 : index
    %66 = vector.load %arg17[%c4, %c0_40] : memref<11x128xf32, #tpu.memory_space<vmem>>, vector<1x128xf32>
    %67 = vector.extract_strided_slice %66 {offsets = [0, 0], sizes = [1, 64], strides = [1, 1]} : vector<1x128xf32> to vector<1x64xf32>
    %68 = vector.broadcast %67 : vector<1x64xf32> to vector<8x64xf32>
    %69 = arith.addf %65, %68 : vector<8x64xf32>
    %70 = arith.negf %69 : vector<8x64xf32>
    %71 = math.exp %70 : vector<8x64xf32>
    %cst_41 = arith.constant 1.000000e+00 : f32
    %72 = vector.broadcast %cst_41 : f32 to vector<8x64xf32>
    %73 = arith.addf %72, %71 : vector<8x64xf32>
    %74 = arith.divf %72, %73 : vector<8x64xf32>
    %75 = arith.mulf %69, %74 : vector<8x64xf32>
    %c2 = arith.constant 2 : index
    %c0_42 = arith.constant 0 : index
    %c0_43 = arith.constant 0 : index
    %76 = vector.load %arg10[%c2, %c0_42, %c0_43] : memref<3x64x32xf32, #tpu.memory_space<vmem>>, vector<1x64x32xf32>
    %77 = vector.shape_cast %76 : vector<1x64x32xf32> to vector<64x32xf32>
    %cst_44 = arith.constant dense<0.000000e+00> : vector<8x32xf32>
    %78 = tpu.matmul %75, %77, %cst_44 {dimension_numbers = #tpu.dot_dimension_numbers<[1], [0], [0], [1], [0, 0, 1, 1], [], []>} : vector<8x64xf32>, vector<64x32xf32>, vector<8x32xf32> -> vector<8x32xf32>
    %c5 = arith.constant 5 : index
    %c0_45 = arith.constant 0 : index
    %79 = vector.load %arg17[%c5, %c0_45] : memref<11x128xf32, #tpu.memory_space<vmem>>, vector<1x128xf32>
    %80 = vector.extract_strided_slice %79 {offsets = [0, 0], sizes = [1, 32], strides = [1, 1]} : vector<1x128xf32> to vector<1x32xf32>
    %81 = vector.broadcast %80 : vector<1x32xf32> to vector<8x32xf32>
    %82 = arith.addf %78, %81 : vector<8x32xf32>
    %83 = arith.negf %31 : vector<8x32xf32>
    %84 = math.exp %83 : vector<8x32xf32>
    %cst_46 = arith.constant 1.000000e+00 : f32
    %85 = vector.broadcast %cst_46 : f32 to vector<8x32xf32>
    %86 = arith.addf %85, %84 : vector<8x32xf32>
    %87 = arith.divf %85, %86 : vector<8x32xf32>
    %88 = arith.mulf %31, %87 : vector<8x32xf32>
    %c0_47 = arith.constant 0 : index
    %c0_48 = arith.constant 0 : index
    %c0_49 = arith.constant 0 : index
    %89 = vector.load %arg12[%c0_47, %c0_48, %c0_49] : memref<3x32x64xf32, #tpu.memory_space<vmem>>, vector<1x32x64xf32>
    %90 = vector.shape_cast %89 : vector<1x32x64xf32> to vector<32x64xf32>
    %cst_50 = arith.constant dense<0.000000e+00> : vector<8x64xf32>
    %91 = tpu.matmul %88, %90, %cst_50 {dimension_numbers = #tpu.dot_dimension_numbers<[1], [0], [0], [1], [0, 0, 1, 1], [], []>} : vector<8x32xf32>, vector<32x64xf32>, vector<8x64xf32> -> vector<8x64xf32>
    %92 = arith.negf %82 : vector<8x32xf32>
    %93 = math.exp %92 : vector<8x32xf32>
    %cst_51 = arith.constant 1.000000e+00 : f32
    %94 = vector.broadcast %cst_51 : f32 to vector<8x32xf32>
    %95 = arith.addf %94, %93 : vector<8x32xf32>
    %96 = arith.divf %94, %95 : vector<8x32xf32>
    %97 = arith.mulf %82, %96 : vector<8x32xf32>
    %c1_52 = arith.constant 1 : index
    %c0_53 = arith.constant 0 : index
    %c0_54 = arith.constant 0 : index
    %98 = vector.load %arg12[%c1_52, %c0_53, %c0_54] : memref<3x32x64xf32, #tpu.memory_space<vmem>>, vector<1x32x64xf32>
    %99 = vector.shape_cast %98 : vector<1x32x64xf32> to vector<32x64xf32>
    %cst_55 = arith.constant dense<0.000000e+00> : vector<8x64xf32>
    %100 = tpu.matmul %97, %99, %cst_55 {dimension_numbers = #tpu.dot_dimension_numbers<[1], [0], [0], [1], [0, 0, 1, 1], [], []>} : vector<8x32xf32>, vector<32x64xf32>, vector<8x64xf32> -> vector<8x64xf32>
    %101 = arith.addf %91, %100 : vector<8x64xf32>
    %102 = arith.negf %62 : vector<8x32xf32>
    %103 = math.exp %102 : vector<8x32xf32>
    %cst_56 = arith.constant 1.000000e+00 : f32
    %104 = vector.broadcast %cst_56 : f32 to vector<8x32xf32>
    %105 = arith.addf %104, %103 : vector<8x32xf32>
    %106 = arith.divf %104, %105 : vector<8x32xf32>
    %107 = arith.mulf %62, %106 : vector<8x32xf32>
    %c2_57 = arith.constant 2 : index
    %c0_58 = arith.constant 0 : index
    %c0_59 = arith.constant 0 : index
    %108 = vector.load %arg12[%c2_57, %c0_58, %c0_59] : memref<3x32x64xf32, #tpu.memory_space<vmem>>, vector<1x32x64xf32>
    %109 = vector.shape_cast %108 : vector<1x32x64xf32> to vector<32x64xf32>
    %cst_60 = arith.constant dense<0.000000e+00> : vector<8x64xf32>
    %110 = tpu.matmul %107, %109, %cst_60 {dimension_numbers = #tpu.dot_dimension_numbers<[1], [0], [0], [1], [0, 0, 1, 1], [], []>} : vector<8x32xf32>, vector<32x64xf32>, vector<8x64xf32> -> vector<8x64xf32>
    %111 = arith.addf %101, %110 : vector<8x64xf32>
    %c8 = arith.constant 8 : index
    %c0_61 = arith.constant 0 : index
    %112 = vector.load %arg17[%c8, %c0_61] : memref<11x128xf32, #tpu.memory_space<vmem>>, vector<1x128xf32>
    %113 = vector.extract_strided_slice %112 {offsets = [0, 0], sizes = [1, 64], strides = [1, 1]} : vector<1x128xf32> to vector<1x64xf32>
    %114 = vector.broadcast %113 : vector<1x64xf32> to vector<8x64xf32>
    %115 = arith.addf %111, %114 : vector<8x64xf32>
    %116 = vector.extract_strided_slice %115 {offsets = [0, 0], sizes = [8, 32], strides = [1, 1]} : vector<8x64xf32> to vector<8x32xf32>
    %117 = vector.extract_strided_slice %115 {offsets = [0, 32], sizes = [8, 32], strides = [1, 1]} : vector<8x64xf32> to vector<8x32xf32>
    %c0_62 = arith.constant 0 : index
    %c0_63 = arith.constant 0 : index
    %118 = vector.load %arg1[%c0_62, %c0_63] : memref<8x1xf32, #tpu.memory_space<vmem>>, vector<8x1xf32>
    %c0_64 = arith.constant 0 : index
    %c0_65 = arith.constant 0 : index
    %119 = vector.load %arg8[%c0_64, %c0_65] : memref<1x64xf32, #tpu.memory_space<vmem>>, vector<1x64xf32>
    %120 = vector.broadcast %118 : vector<8x1xf32> to vector<8x64xf32>
    %121 = vector.broadcast %119 : vector<1x64xf32> to vector<8x64xf32>
    %122 = arith.mulf %120, %121 : vector<8x64xf32>
    %c2_66 = arith.constant 2 : index
    %c0_67 = arith.constant 0 : index
    %123 = vector.load %arg17[%c2_66, %c0_67] : memref<11x128xf32, #tpu.memory_space<vmem>>, vector<1x128xf32>
    %124 = vector.extract_strided_slice %123 {offsets = [0, 0], sizes = [1, 64], strides = [1, 1]} : vector<1x128xf32> to vector<1x64xf32>
    %125 = vector.broadcast %124 : vector<1x64xf32> to vector<8x64xf32>
    %126 = arith.addf %122, %125 : vector<8x64xf32>
    %127 = arith.negf %126 : vector<8x64xf32>
    %128 = math.exp %127 : vector<8x64xf32>
    %cst_68 = arith.constant 1.000000e+00 : f32
    %129 = vector.broadcast %cst_68 : f32 to vector<8x64xf32>
    %130 = arith.addf %129, %128 : vector<8x64xf32>
    %131 = arith.divf %129, %130 : vector<8x64xf32>
    %132 = arith.mulf %126, %131 : vector<8x64xf32>
    %c1_69 = arith.constant 1 : index
    %c0_70 = arith.constant 0 : index
    %c0_71 = arith.constant 0 : index
    %133 = vector.load %arg10[%c1_69, %c0_70, %c0_71] : memref<3x64x32xf32, #tpu.memory_space<vmem>>, vector<1x64x32xf32>
    %134 = vector.shape_cast %133 : vector<1x64x32xf32> to vector<64x32xf32>
    %cst_72 = arith.constant dense<0.000000e+00> : vector<8x32xf32>
    %135 = tpu.matmul %132, %134, %cst_72 {dimension_numbers = #tpu.dot_dimension_numbers<[1], [0], [0], [1], [0, 0, 1, 1], [], []>} : vector<8x64xf32>, vector<64x32xf32>, vector<8x32xf32> -> vector<8x32xf32>
    %c3 = arith.constant 3 : index
    %c0_73 = arith.constant 0 : index
    %136 = vector.load %arg17[%c3, %c0_73] : memref<11x128xf32, #tpu.memory_space<vmem>>, vector<1x128xf32>
    %137 = vector.extract_strided_slice %136 {offsets = [0, 0], sizes = [1, 32], strides = [1, 1]} : vector<1x128xf32> to vector<1x32xf32>
    %138 = vector.broadcast %137 : vector<1x32xf32> to vector<8x32xf32>
    %139 = arith.addf %135, %138 : vector<8x32xf32>
    %cst_74 = arith.constant 1.000000e+00 : f32
    %140 = vector.broadcast %cst_74 : f32 to vector<8x32xf32>
    %141 = arith.addf %140, %117 : vector<8x32xf32>
    %142 = arith.mulf %141, %139 : vector<8x32xf32>
    %143 = arith.addf %142, %116 : vector<8x32xf32>
    %c0_75 = arith.constant 0 : index
    %c0_76 = arith.constant 0 : index
    %c0_77 = arith.constant 0 : index
    %144 = vector.load %arg16[%c0_75, %c0_76, %c0_77] : memref<2x4x32xf32, #tpu.memory_space<vmem>>, vector<1x4x32xf32>
    %145 = vector.shape_cast %144 : vector<1x4x32xf32> to vector<4x32xf32>
    %cst_78 = arith.constant dense<0.000000e+00> : vector<8xf32>
    %146 = vector.multi_reduction <add>, %143, %cst_78 [1] : vector<8x32xf32> to vector<8xf32>
    %147 = vector.shape_cast %146 : vector<8xf32> to vector<8x1xf32>
    %cst_79 = arith.constant 3.200000e+01 : f32
    %148 = vector.broadcast %cst_79 : f32 to vector<8x1xf32>
    %149 = arith.divf %147, %148 : vector<8x1xf32>
    %150 = arith.mulf %143, %143 : vector<8x32xf32>
    %cst_80 = arith.constant dense<0.000000e+00> : vector<8xf32>
    %151 = vector.multi_reduction <add>, %150, %cst_80 [1] : vector<8x32xf32> to vector<8xf32>
    %152 = vector.shape_cast %151 : vector<8xf32> to vector<8x1xf32>
    %cst_81 = arith.constant 3.200000e+01 : f32
    %153 = vector.broadcast %cst_81 : f32 to vector<8x1xf32>
    %154 = arith.divf %152, %153 : vector<8x1xf32>
    %155 = arith.mulf %149, %149 : vector<8x1xf32>
    %156 = arith.subf %154, %155 : vector<8x1xf32>
    %157 = vector.broadcast %149 : vector<8x1xf32> to vector<8x32xf32>
    %158 = arith.subf %143, %157 : vector<8x32xf32>
    %cst_82 = arith.constant 9.99999974E-6 : f32
    %159 = vector.broadcast %cst_82 : f32 to vector<8x1xf32>
    %160 = arith.addf %156, %159 : vector<8x1xf32>
    %161 = math.rsqrt %160 : vector<8x1xf32>
    %162 = vector.broadcast %161 : vector<8x1xf32> to vector<8x32xf32>
    %163 = arith.mulf %158, %162 : vector<8x32xf32>
    %c0_83 = arith.constant 0 : index
    %c0_84 = arith.constant 0 : index
    %c0_85 = arith.constant 0 : index
    %c0_86 = arith.constant 0 : index
    %164 = vector.load %arg15[%c0_83, %c0_84, %c0_85, %c0_86] : memref<2x3x32x32xf32, #tpu.memory_space<vmem>>, vector<1x1x32x32xf32>
    %165 = vector.shape_cast %164 : vector<1x1x32x32xf32> to vector<32x32xf32>
    %cst_87 = arith.constant dense<0.000000e+00> : vector<8x32xf32>
    %166 = tpu.matmul %163, %165, %cst_87 {dimension_numbers = #tpu.dot_dimension_numbers<[1], [0], [0], [1], [0, 0, 1, 1], [], []>} : vector<8x32xf32>, vector<32x32xf32>, vector<8x32xf32> -> vector<8x32xf32>
    %167 = vector.extract_strided_slice %145 {offsets = [0, 0], sizes = [1, 32], strides = [1, 1]} : vector<4x32xf32> to vector<1x32xf32>
    %168 = vector.broadcast %167 : vector<1x32xf32> to vector<8x32xf32>
    %169 = arith.addf %166, %168 : vector<8x32xf32>
    %cst_88 = arith.constant 0.000000e+00 : f32
    %170 = vector.broadcast %cst_88 : f32 to vector<8x32xf32>
    %171 = arith.maximumf %169, %170 : vector<8x32xf32>
    %c0_89 = arith.constant 0 : index
    %c1_90 = arith.constant 1 : index
    %c0_91 = arith.constant 0 : index
    %c0_92 = arith.constant 0 : index
    %172 = vector.load %arg15[%c0_89, %c1_90, %c0_91, %c0_92] : memref<2x3x32x32xf32, #tpu.memory_space<vmem>>, vector<1x1x32x32xf32>
    %173 = vector.shape_cast %172 : vector<1x1x32x32xf32> to vector<32x32xf32>
    %cst_93 = arith.constant dense<0.000000e+00> : vector<8x32xf32>
    %174 = tpu.matmul %171, %173, %cst_93 {dimension_numbers = #tpu.dot_dimension_numbers<[1], [0], [0], [1], [0, 0, 1, 1], [], []>} : vector<8x32xf32>, vector<32x32xf32>, vector<8x32xf32> -> vector<8x32xf32>
    %175 = vector.extract_strided_slice %145 {offsets = [1, 0], sizes = [1, 32], strides = [1, 1]} : vector<4x32xf32> to vector<1x32xf32>
    %176 = vector.broadcast %175 : vector<1x32xf32> to vector<8x32xf32>
    %177 = arith.addf %174, %176 : vector<8x32xf32>
    %cst_94 = arith.constant 0.000000e+00 : f32
    %178 = vector.broadcast %cst_94 : f32 to vector<8x32xf32>
    %179 = arith.maximumf %177, %178 : vector<8x32xf32>
    %c0_95 = arith.constant 0 : index
    %c2_96 = arith.constant 2 : index
    %c0_97 = arith.constant 0 : index
    %c0_98 = arith.constant 0 : index
    %180 = vector.load %arg15[%c0_95, %c2_96, %c0_97, %c0_98] : memref<2x3x32x32xf32, #tpu.memory_space<vmem>>, vector<1x1x32x32xf32>
    %181 = vector.shape_cast %180 : vector<1x1x32x32xf32> to vector<32x32xf32>
    %cst_99 = arith.constant dense<0.000000e+00> : vector<8x32xf32>
    %182 = tpu.matmul %179, %181, %cst_99 {dimension_numbers = #tpu.dot_dimension_numbers<[1], [0], [0], [1], [0, 0, 1, 1], [], []>} : vector<8x32xf32>, vector<32x32xf32>, vector<8x32xf32> -> vector<8x32xf32>
    %183 = vector.extract_strided_slice %145 {offsets = [2, 0], sizes = [1, 32], strides = [1, 1]} : vector<4x32xf32> to vector<1x32xf32>
    %184 = vector.broadcast %183 : vector<1x32xf32> to vector<8x32xf32>
    %185 = arith.addf %182, %184 : vector<8x32xf32>
    %186 = vector.extract_strided_slice %145 {offsets = [3, 0], sizes = [1, 32], strides = [1, 1]} : vector<4x32xf32> to vector<1x32xf32>
    %187 = vector.broadcast %186 : vector<1x32xf32> to vector<8x32xf32>
    %188 = arith.mulf %185, %187 : vector<8x32xf32>
    %189 = arith.addf %163, %188 : vector<8x32xf32>
    %c1_100 = arith.constant 1 : index
    %c0_101 = arith.constant 0 : index
    %c0_102 = arith.constant 0 : index
    %190 = vector.load %arg16[%c1_100, %c0_101, %c0_102] : memref<2x4x32xf32, #tpu.memory_space<vmem>>, vector<1x4x32xf32>
    %191 = vector.shape_cast %190 : vector<1x4x32xf32> to vector<4x32xf32>
    %cst_103 = arith.constant dense<0.000000e+00> : vector<8xf32>
    %192 = vector.multi_reduction <add>, %189, %cst_103 [1] : vector<8x32xf32> to vector<8xf32>
    %193 = vector.shape_cast %192 : vector<8xf32> to vector<8x1xf32>
    %cst_104 = arith.constant 3.200000e+01 : f32
    %194 = vector.broadcast %cst_104 : f32 to vector<8x1xf32>
    %195 = arith.divf %193, %194 : vector<8x1xf32>
    %196 = arith.mulf %189, %189 : vector<8x32xf32>
    %cst_105 = arith.constant dense<0.000000e+00> : vector<8xf32>
    %197 = vector.multi_reduction <add>, %196, %cst_105 [1] : vector<8x32xf32> to vector<8xf32>
    %198 = vector.shape_cast %197 : vector<8xf32> to vector<8x1xf32>
    %cst_106 = arith.constant 3.200000e+01 : f32
    %199 = vector.broadcast %cst_106 : f32 to vector<8x1xf32>
    %200 = arith.divf %198, %199 : vector<8x1xf32>
    %201 = arith.mulf %195, %195 : vector<8x1xf32>
    %202 = arith.subf %200, %201 : vector<8x1xf32>
    %203 = vector.broadcast %195 : vector<8x1xf32> to vector<8x32xf32>
    %204 = arith.subf %189, %203 : vector<8x32xf32>
    %cst_107 = arith.constant 9.99999974E-6 : f32
    %205 = vector.broadcast %cst_107 : f32 to vector<8x1xf32>
    %206 = arith.addf %202, %205 : vector<8x1xf32>
    %207 = math.rsqrt %206 : vector<8x1xf32>
    %208 = vector.broadcast %207 : vector<8x1xf32> to vector<8x32xf32>
    %209 = arith.mulf %204, %208 : vector<8x32xf32>
    %c1_108 = arith.constant 1 : index
    %c0_109 = arith.constant 0 : index
    %c0_110 = arith.constant 0 : index
    %c0_111 = arith.constant 0 : index
    %210 = vector.load %arg15[%c1_108, %c0_109, %c0_110, %c0_111] : memref<2x3x32x32xf32, #tpu.memory_space<vmem>>, vector<1x1x32x32xf32>
    %211 = vector.shape_cast %210 : vector<1x1x32x32xf32> to vector<32x32xf32>
    %cst_112 = arith.constant dense<0.000000e+00> : vector<8x32xf32>
    %212 = tpu.matmul %209, %211, %cst_112 {dimension_numbers = #tpu.dot_dimension_numbers<[1], [0], [0], [1], [0, 0, 1, 1], [], []>} : vector<8x32xf32>, vector<32x32xf32>, vector<8x32xf32> -> vector<8x32xf32>
    %213 = vector.extract_strided_slice %191 {offsets = [0, 0], sizes = [1, 32], strides = [1, 1]} : vector<4x32xf32> to vector<1x32xf32>
    %214 = vector.broadcast %213 : vector<1x32xf32> to vector<8x32xf32>
    %215 = arith.addf %212, %214 : vector<8x32xf32>
    %cst_113 = arith.constant 0.000000e+00 : f32
    %216 = vector.broadcast %cst_113 : f32 to vector<8x32xf32>
    %217 = arith.maximumf %215, %216 : vector<8x32xf32>
    %c1_114 = arith.constant 1 : index
    %c1_115 = arith.constant 1 : index
    %c0_116 = arith.constant 0 : index
    %c0_117 = arith.constant 0 : index
    %218 = vector.load %arg15[%c1_114, %c1_115, %c0_116, %c0_117] : memref<2x3x32x32xf32, #tpu.memory_space<vmem>>, vector<1x1x32x32xf32>
    %219 = vector.shape_cast %218 : vector<1x1x32x32xf32> to vector<32x32xf32>
    %cst_118 = arith.constant dense<0.000000e+00> : vector<8x32xf32>
    %220 = tpu.matmul %217, %219, %cst_118 {dimension_numbers = #tpu.dot_dimension_numbers<[1], [0], [0], [1], [0, 0, 1, 1], [], []>} : vector<8x32xf32>, vector<32x32xf32>, vector<8x32xf32> -> vector<8x32xf32>
    %221 = vector.extract_strided_slice %191 {offsets = [1, 0], sizes = [1, 32], strides = [1, 1]} : vector<4x32xf32> to vector<1x32xf32>
    %222 = vector.broadcast %221 : vector<1x32xf32> to vector<8x32xf32>
    %223 = arith.addf %220, %222 : vector<8x32xf32>
    %cst_119 = arith.constant 0.000000e+00 : f32
    %224 = vector.broadcast %cst_119 : f32 to vector<8x32xf32>
    %225 = arith.maximumf %223, %224 : vector<8x32xf32>
    %c1_120 = arith.constant 1 : index
    %c2_121 = arith.constant 2 : index
    %c0_122 = arith.constant 0 : index
    %c0_123 = arith.constant 0 : index
    %226 = vector.load %arg15[%c1_120, %c2_121, %c0_122, %c0_123] : memref<2x3x32x32xf32, #tpu.memory_space<vmem>>, vector<1x1x32x32xf32>
    %227 = vector.shape_cast %226 : vector<1x1x32x32xf32> to vector<32x32xf32>
    %cst_124 = arith.constant dense<0.000000e+00> : vector<8x32xf32>
    %228 = tpu.matmul %225, %227, %cst_124 {dimension_numbers = #tpu.dot_dimension_numbers<[1], [0], [0], [1], [0, 0, 1, 1], [], []>} : vector<8x32xf32>, vector<32x32xf32>, vector<8x32xf32> -> vector<8x32xf32>
    %229 = vector.extract_strided_slice %191 {offsets = [2, 0], sizes = [1, 32], strides = [1, 1]} : vector<4x32xf32> to vector<1x32xf32>
    %230 = vector.broadcast %229 : vector<1x32xf32> to vector<8x32xf32>
    %231 = arith.addf %228, %230 : vector<8x32xf32>
    %232 = vector.extract_strided_slice %191 {offsets = [3, 0], sizes = [1, 32], strides = [1, 1]} : vector<4x32xf32> to vector<1x32xf32>
    %233 = vector.broadcast %232 : vector<1x32xf32> to vector<8x32xf32>
    %234 = arith.mulf %231, %233 : vector<8x32xf32>
    %235 = arith.addf %209, %234 : vector<8x32xf32>
    %cst_125 = arith.constant dense<0.000000e+00> : vector<8xf32>
    %236 = vector.multi_reduction <add>, %235, %cst_125 [1] : vector<8x32xf32> to vector<8xf32>
    %237 = vector.shape_cast %236 : vector<8xf32> to vector<8x1xf32>
    %cst_126 = arith.constant 3.200000e+01 : f32
    %238 = vector.broadcast %cst_126 : f32 to vector<8x1xf32>
    %239 = arith.divf %237, %238 : vector<8x1xf32>
    %240 = arith.mulf %235, %235 : vector<8x32xf32>
    %cst_127 = arith.constant dense<0.000000e+00> : vector<8xf32>
    %241 = vector.multi_reduction <add>, %240, %cst_127 [1] : vector<8x32xf32> to vector<8xf32>
    %242 = vector.shape_cast %241 : vector<8xf32> to vector<8x1xf32>
    %cst_128 = arith.constant 3.200000e+01 : f32
    %243 = vector.broadcast %cst_128 : f32 to vector<8x1xf32>
    %244 = arith.divf %242, %243 : vector<8x1xf32>
    %245 = arith.mulf %239, %239 : vector<8x1xf32>
    %246 = arith.subf %244, %245 : vector<8x1xf32>
    %247 = vector.broadcast %239 : vector<8x1xf32> to vector<8x32xf32>
    %248 = arith.subf %235, %247 : vector<8x32xf32>
    %cst_129 = arith.constant 9.99999974E-6 : f32
    %249 = vector.broadcast %cst_129 : f32 to vector<8x1xf32>
    %250 = arith.addf %246, %249 : vector<8x1xf32>
    %251 = math.rsqrt %250 : vector<8x1xf32>
    %252 = vector.broadcast %251 : vector<8x1xf32> to vector<8x32xf32>
    %253 = arith.mulf %248, %252 : vector<8x32xf32>
    %c1_130 = arith.constant 1 : index
    %c0_131 = arith.constant 0 : index
    %c0_132 = arith.constant 0 : index
    %254 = vector.load %arg13[%c1_130, %c0_131, %c0_132] : memref<5x32x32xf32, #tpu.memory_space<vmem>>, vector<1x32x32xf32>
    %255 = vector.shape_cast %254 : vector<1x32x32xf32> to vector<32x32xf32>
    %cst_133 = arith.constant dense<0.000000e+00> : vector<8x32xf32>
    %256 = tpu.matmul %253, %255, %cst_133 {dimension_numbers = #tpu.dot_dimension_numbers<[1], [0], [0], [1], [0, 0, 1, 1], [], []>} : vector<8x32xf32>, vector<32x32xf32>, vector<8x32xf32> -> vector<8x32xf32>
    %c2_134 = arith.constant 2 : index
    %c0_135 = arith.constant 0 : index
    %c0_136 = arith.constant 0 : index
    %257 = vector.load %arg13[%c2_134, %c0_135, %c0_136] : memref<5x32x32xf32, #tpu.memory_space<vmem>>, vector<1x32x32xf32>
    %258 = vector.shape_cast %257 : vector<1x32x32xf32> to vector<32x32xf32>
    %cst_137 = arith.constant dense<0.000000e+00> : vector<8x32xf32>
    %259 = tpu.matmul %31, %258, %cst_137 {dimension_numbers = #tpu.dot_dimension_numbers<[1], [0], [0], [1], [0, 0, 1, 1], [], []>} : vector<8x32xf32>, vector<32x32xf32>, vector<8x32xf32> -> vector<8x32xf32>
    %260 = arith.addf %256, %259 : vector<8x32xf32>
    %c3_138 = arith.constant 3 : index
    %c0_139 = arith.constant 0 : index
    %c0_140 = arith.constant 0 : index
    %261 = vector.load %arg13[%c3_138, %c0_139, %c0_140] : memref<5x32x32xf32, #tpu.memory_space<vmem>>, vector<1x32x32xf32>
    %262 = vector.shape_cast %261 : vector<1x32x32xf32> to vector<32x32xf32>
    %cst_141 = arith.constant dense<0.000000e+00> : vector<8x32xf32>
    %263 = tpu.matmul %82, %262, %cst_141 {dimension_numbers = #tpu.dot_dimension_numbers<[1], [0], [0], [1], [0, 0, 1, 1], [], []>} : vector<8x32xf32>, vector<32x32xf32>, vector<8x32xf32> -> vector<8x32xf32>
    %264 = arith.addf %260, %263 : vector<8x32xf32>
    %c4_142 = arith.constant 4 : index
    %c0_143 = arith.constant 0 : index
    %c0_144 = arith.constant 0 : index
    %265 = vector.load %arg13[%c4_142, %c0_143, %c0_144] : memref<5x32x32xf32, #tpu.memory_space<vmem>>, vector<1x32x32xf32>
    %266 = vector.shape_cast %265 : vector<1x32x32xf32> to vector<32x32xf32>
    %cst_145 = arith.constant dense<0.000000e+00> : vector<8x32xf32>
    %267 = tpu.matmul %62, %266, %cst_145 {dimension_numbers = #tpu.dot_dimension_numbers<[1], [0], [0], [1], [0, 0, 1, 1], [], []>} : vector<8x32xf32>, vector<32x32xf32>, vector<8x32xf32> -> vector<8x32xf32>
    %268 = arith.addf %264, %267 : vector<8x32xf32>
    %c9 = arith.constant 9 : index
    %c0_146 = arith.constant 0 : index
    %269 = vector.load %arg17[%c9, %c0_146] : memref<11x128xf32, #tpu.memory_space<vmem>>, vector<1x128xf32>
    %270 = vector.extract_strided_slice %269 {offsets = [0, 0], sizes = [1, 32], strides = [1, 1]} : vector<1x128xf32> to vector<1x32xf32>
    %271 = vector.broadcast %270 : vector<1x32xf32> to vector<8x32xf32>
    %272 = arith.addf %268, %271 : vector<8x32xf32>
    %273 = arith.negf %272 : vector<8x32xf32>
    %274 = math.exp %273 : vector<8x32xf32>
    %cst_147 = arith.constant 1.000000e+00 : f32
    %275 = vector.broadcast %cst_147 : f32 to vector<8x32xf32>
    %276 = arith.addf %275, %274 : vector<8x32xf32>
    %277 = arith.divf %275, %276 : vector<8x32xf32>
    %278 = arith.mulf %272, %277 : vector<8x32xf32>
    %c0_148 = arith.constant 0 : index
    %c0_149 = arith.constant 0 : index
    %279 = vector.load %arg14[%c0_148, %c0_149] : memref<32x128xf32, #tpu.memory_space<vmem>>, vector<32x128xf32>
    %cst_150 = arith.constant dense<0.000000e+00> : vector<8x128xf32>
    %280 = tpu.matmul %278, %279, %cst_150 {dimension_numbers = #tpu.dot_dimension_numbers<[1], [0], [0], [1], [0, 0, 1, 1], [], []>} : vector<8x32xf32>, vector<32x128xf32>, vector<8x128xf32> -> vector<8x128xf32>
    %c10 = arith.constant 10 : index
    %c0_151 = arith.constant 0 : index
    %281 = vector.load %arg17[%c10, %c0_151] : memref<11x128xf32, #tpu.memory_space<vmem>>, vector<1x128xf32>
    %282 = vector.broadcast %281 : vector<1x128xf32> to vector<8x128xf32>
    %283 = arith.addf %280, %282 : vector<8x128xf32>
    %c0_152 = arith.constant 0 : index
    %c0_153 = arith.constant 0 : index
    %284 = vector.load %arg18[%c0_152, %c0_153] : memref<8x128xf32, #tpu.memory_space<vmem>>, vector<8x128xf32>
    tpu.vector_store %arg18[%c0_152, %c0_153], %283 {strides = array<i32>} : memref<8x128xf32, #tpu.memory_space<vmem>>, vector<8x128xf32>,
    return
  }
  func.func @transform_0(%arg0: i32) -> (i32, i32) {
    %c0_i32 = arith.constant 0 : i32
    %c0_i32_0 = arith.constant 0 : i32
    return %arg0, %c0_i32 : i32, i32
  }
  func.func @transform_1(%arg0: i32) -> (i32, i32) {
    %c0_i32 = arith.constant 0 : i32
    %c0_i32_0 = arith.constant 0 : i32
    return %arg0, %c0_i32 : i32, i32
  }
  func.func @transform_2(%arg0: i32) -> (i32, i32) {
    %c0_i32 = arith.constant 0 : i32
    %c0_i32_0 = arith.constant 0 : i32
    return %arg0, %c0_i32 : i32, i32
  }
  func.func @transform_3(%arg0: i32) -> (i32, i32) {
    %c0_i32 = arith.constant 0 : i32
    %c0_i32_0 = arith.constant 0 : i32
    return %arg0, %c0_i32 : i32, i32
  }
  func.func @transform_4(%arg0: i32) -> (i32, i32) {
    %c0_i32 = arith.constant 0 : i32
    %c0_i32_0 = arith.constant 0 : i32
    return %arg0, %c0_i32 : i32, i32
  }
  func.func @transform_5(%arg0: i32) -> (i32, i32) {
    %c0_i32 = arith.constant 0 : i32
    %c0_i32_0 = arith.constant 0 : i32
    %c0_i32_1 = arith.constant 0 : i32
    return %c0_i32, %c0_i32_0 : i32, i32
  }
  func.func @transform_6(%arg0: i32) -> (i32, i32) {
    %c0_i32 = arith.constant 0 : i32
    %c0_i32_0 = arith.constant 0 : i32
    %c0_i32_1 = arith.constant 0 : i32
    return %c0_i32, %c0_i32_0 : i32, i32
  }
  func.func @transform_7(%arg0: i32) -> (i32, i32) {
    %c0_i32 = arith.constant 0 : i32
    %c0_i32_0 = arith.constant 0 : i32
    %c0_i32_1 = arith.constant 0 : i32
    return %c0_i32, %c0_i32_0 : i32, i32
  }
  func.func @transform_8(%arg0: i32) -> (i32, i32) {
    %c0_i32 = arith.constant 0 : i32
    %c0_i32_0 = arith.constant 0 : i32
    %c0_i32_1 = arith.constant 0 : i32
    return %c0_i32, %c0_i32_0 : i32, i32
  }
  func.func @transform_9(%arg0: i32) -> (i32, i32, i32) {
    %c0_i32 = arith.constant 0 : i32
    %c0_i32_0 = arith.constant 0 : i32
    %c0_i32_1 = arith.constant 0 : i32
    %c0_i32_2 = arith.constant 0 : i32
    return %c0_i32, %c0_i32_0, %c0_i32_1 : i32, i32, i32
  }
  func.func @transform_10(%arg0: i32) -> (i32, i32, i32) {
    %c0_i32 = arith.constant 0 : i32
    %c0_i32_0 = arith.constant 0 : i32
    %c0_i32_1 = arith.constant 0 : i32
    %c0_i32_2 = arith.constant 0 : i32
    return %c0_i32, %c0_i32_0, %c0_i32_1 : i32, i32, i32
  }
  func.func @transform_11(%arg0: i32) -> (i32, i32, i32) {
    %c0_i32 = arith.constant 0 : i32
    %c0_i32_0 = arith.constant 0 : i32
    %c0_i32_1 = arith.constant 0 : i32
    %c0_i32_2 = arith.constant 0 : i32
    return %c0_i32, %c0_i32_0, %c0_i32_1 : i32, i32, i32
  }
  func.func @transform_12(%arg0: i32) -> (i32, i32, i32) {
    %c0_i32 = arith.constant 0 : i32
    %c0_i32_0 = arith.constant 0 : i32
    %c0_i32_1 = arith.constant 0 : i32
    %c0_i32_2 = arith.constant 0 : i32
    return %c0_i32, %c0_i32_0, %c0_i32_1 : i32, i32, i32
  }
  func.func @transform_13(%arg0: i32) -> (i32, i32) {
    %c0_i32 = arith.constant 0 : i32
    %c0_i32_0 = arith.constant 0 : i32
    %c0_i32_1 = arith.constant 0 : i32
    return %c0_i32, %c0_i32_0 : i32, i32
  }
  func.func @transform_14(%arg0: i32) -> (i32, i32, i32, i32) {
    %c0_i32 = arith.constant 0 : i32
    %c0_i32_0 = arith.constant 0 : i32
    %c0_i32_1 = arith.constant 0 : i32
    %c0_i32_2 = arith.constant 0 : i32
    %c0_i32_3 = arith.constant 0 : i32
    return %c0_i32, %c0_i32_0, %c0_i32_1, %c0_i32_2 : i32, i32, i32, i32
  }
  func.func @transform_15(%arg0: i32) -> (i32, i32, i32) {
    %c0_i32 = arith.constant 0 : i32
    %c0_i32_0 = arith.constant 0 : i32
    %c0_i32_1 = arith.constant 0 : i32
    %c0_i32_2 = arith.constant 0 : i32
    return %c0_i32, %c0_i32_0, %c0_i32_1 : i32, i32, i32
  }
  func.func @transform_16(%arg0: i32) -> (i32, i32) {
    %c0_i32 = arith.constant 0 : i32
    %c0_i32_0 = arith.constant 0 : i32
    %c0_i32_1 = arith.constant 0 : i32
    return %c0_i32, %c0_i32_0 : i32, i32
  }
  func.func @transform_17(%arg0: i32) -> (i32, i32) {
    %c0_i32 = arith.constant 0 : i32
    %c0_i32_0 = arith.constant 0 : i32
    return %arg0, %c0_i32 : i32, i32
  }
}

</mosaic_0001>

<bundles_post_ra>
// kernel: tpu_custom_call.1
= control target key start
LH: loop header
LB: loop body
LE: loop exit
PB: predicated region body
PF: predicated region fallthrough
CT: control target
= control target key end

     0   :  { %s4463_s0 = inlined_call_operand.vmem [shape: f32[8,1], index: 0, kind: input, shape index: {}]   ;;  %s4464_s1 = inlined_call_operand.vmem [shape: f32[64,8], index: 1, kind: input, shape index: {}]   ;;  %s4465_s2 = inlined_call_operand.vmem [shape: f32[8,8], index: 2, kind: input, shape index: {}]   ;;  %s4466_s3 = inlined_call_operand.vmem [shape: f32[8,4], index: 3, kind: input, shape index: {}]   ;;  %s4467_s4 = inlined_call_operand.vmem [shape: f32[8,1], index: 4, kind: input, shape index: {}]   ;;  %s4468_s5 = inlined_call_operand.vmem [shape: f32[1,128], index: 5, kind: input, shape index: {}]   ;;  %s4469_s6 = inlined_call_operand.vmem [shape: f32[8,64], index: 6, kind: input, shape index: {}]   ;;  %s4470_s7 = inlined_call_operand.vmem [shape: f32[1,64], index: 7, kind: input, shape index: {}]   ;;  %s4471_s8 = inlined_call_operand.vmem [shape: f32[4,64], index: 8, kind: input, shape index: {}]   ;;  %s4472_s9 = inlined_call_operand.vmem [shape: f32[3,64,32], index: 9, kind: input, shape index: {}]   ;;  %s4473_s10 = inlined_call_operand.vmem [shape: f32[2,128,32], index: 10, kind: input, shape index: {}]   ;;  %s4474_s11 = inlined_call_operand.vmem [shape: f32[3,32,64], index: 11, kind: input, shape index: {}]   ;;  %s4475_s12 = inlined_call_operand.vmem [shape: f32[5,32,32], index: 12, kind: input, shape index: {}]   ;;  %s4476_s13 = inlined_call_operand.vmem [shape: f32[32,128], index: 13, kind: input, shape index: {}]   ;;  %s4477_s14 = inlined_call_operand.vmem [shape: f32[2,3,32,32], index: 14, kind: input, shape index: {}]   ;;  %s4478_s15 = inlined_call_operand.vmem [shape: f32[2,4,32], index: 15, kind: input, shape index: {}]   ;;  %s4479_s16 = inlined_call_operand.vmem [shape: f32[11,128], index: 16, kind: input, shape index: {}]   ;;  %s4480_s17 = inlined_call_operand.hbm [shape: f32[8,128], index: 17, kind: output, shape index: {}]  }
   0x1   :  { %4482 = sst [smem:[#allocation5_spill]] %s4463_s0 }
   0x2   :  { %4483 = sst [smem:[#allocation6_spill]] %s4464_s1 }
   0x3   :  { %v65_v0 = vld [vmem:[%s4469_s6] sm:$0xff]  ;;  %s4484_s0 = sld [smem:[#allocation6_spill]]  ;;  %vm71_vm0 = vcmask 64512   ;;  %v3511_v3 = vmov 0  }
   0x4   :  { %v558_v1 = vld [vmem:[%s4467_s4] sm:$0xff]  ;;  %3373 = vset.pattern.permute.xlu0 %v3511_v3  ;;  %3037 = vmatprep.subr.mxu0 %v65_v0 }
   0x5   :  { %562 = vperm.xlu0 %3373, %v558_v1   ;;  %3038 = vmatpush3.msra.mxu0 %v65_v0 }
   0x6   :  { %3374 = vset.pattern.permute.xlu1 %v3511_v3 }
   0x9   :  { %v57_v2 = vld [vmem:[%s4484_s0] sm:$0xff]  ;;  %v58_v4 = vld [vmem:[%s4484_s0 + $0x8] sm:$0xff]  ;;  %v59_v5 = vld [vmem:[%s4484_s0 + $0x10] sm:$0xff] }
   0xa   :  { %3039 = vmatprep.mubr.msk.f32.mxu0 %vm71_vm0, %v57_v2  ;;  %v60_v6 = vld [vmem:[%s4484_s0 + $0x18] sm:$0xff] }
   0xb   :  { %3040 = vmatmul.mubr.msk.f32.vlgmr.msra.gmra.mxu0 %vm71_vm0, %v58_v4 }
   0xc   :  { %3042 = vmatprep.mubr.msk.f32.mxu0 %vm71_vm0, %v59_v5 }
   0xd   :  { %22 = vsyncpa [#allocation3], 0  ;;  %v61_v7 = vld [vmem:[%s4484_s0 + $0x20] sm:$0xff]  ;;  %v62_v8 = vld [vmem:[%s4484_s0 + $0x28] sm:$0xff]  ;;  %v3512_v11 = vmov 0.0   ;;  %vm3513_vm1 = vmmov 0  }
   0xe   :  { %v63_v9 = vld [vmem:[%s4484_s0 + $0x30] sm:$0xff]  ;;  %v64_v10 = vld [vmem:[%s4484_s0 + $0x38] sm:$0xff]  ;;  %3079 = vmatprep.subr.mxu0 %v3512_v11  ;;  %v2776_v14 = vld [vmem:[%s4473_s10 + $0xe8] sm:$0xff]  ;;  %v3514_v50 = vmov 683565275   ;;  %s4485_s6 = sld [smem:[#allocation5_spill]] }
   0xf   :  { %3043 = vmatmul.mubr.msk.f32.gmra.mxu0 %vm71_vm0, %v60_v6  ;;  %v2778_v12 = vld [vmem:[%s4473_s10 + $0xf8] sm:$0xff]  ;;  %v2777_v13 = vld [vmem:[%s4473_s10 + $0xf0] sm:$0xff]  ;;  %v2775_v15 = vld [vmem:[%s4473_s10 + $0xe0] sm:$0xff]  ;;  %v3515_v52 = vmov 2475754826   ;;  %s3521_s23 = smov 96  }
  0x10   :  { %3045 = vmatprep.mubr.msk.f32.mxu0 %vm71_vm0, %v61_v7  ;;  %3080 = vmatpush3.msra.mxu0 %v2778_v12  ;;  %v2774_v16 = vld [vmem:[%s4473_s10 + $0xd8] sm:$0xff]  ;;  %v2773_v17 = vld [vmem:[%s4473_s10 + $0xd0] sm:$0xff]  ;;  %v2772_v18 = vld [vmem:[%s4473_s10 + $0xc8] sm:$0xff]  ;;  %v3516_v54 = vmov 2131351028   ;;  %v405_v12 = vlaneseq }
  0x11   :  { %3081 = vmatprep.subr.mxu0 %v3512_v11  ;;  %v2771_v19 = vld [vmem:[%s4473_s10 + $0xc0] sm:$0xff]  ;;  %v2770_v20 = vld [vmem:[%s4473_s10 + $0xb8] sm:$0xff]  ;;  %v2769_v21 = vld [vmem:[%s4473_s10 + $0xb0] sm:$0xff]  ;;  %v3517_v56 = vmov 2102212464  }
  0x12   :  { %3082 = vmatpush3.msra.mxu0 %v2777_v13  ;;  %v2768_v22 = vld [vmem:[%s4473_s10 + $0xa8] sm:$0xff]  ;;  %v2767_v23 = vld [vmem:[%s4473_s10 + $0xa0] sm:$0xff]  ;;  %v2766_v24 = vld [vmem:[%s4473_s10 + $0x98] sm:$0xff]  ;;  %v3518_v58 = vmov 920167782  }
  0x13   :  { %3046 = vmatmul.mubr.msk.f32.gmra.mxu0 %vm71_vm0, %v62_v8  ;;  %3083 = vmatprep.subr.mxu0 %v3512_v11  ;;  %v2765_v25 = vld [vmem:[%s4473_s10 + $0x90] sm:$0xff]  ;;  %v2764_v26 = vld [vmem:[%s4473_s10 + $0x88] sm:$0xff]  ;;  %v2763_v27 = vld [vmem:[%s4473_s10 + $0x80] sm:$0xff]  ;;  %v3519_v3 = vmov 1326507024  }
  0x14   :  { %3048 = vmatprep.mubr.msk.f32.mxu0 %vm71_vm0, %v63_v9  ;;  %3084 = vmatpush3.msra.mxu0 %v2776_v14  ;;  %v264_v28 = vld [vmem:[%s4472_s9 + $0x38] sm:$0xff]  ;;  %v263_v29 = vld [vmem:[%s4472_s9 + $0x30] sm:$0xff]  ;;  %v262_v30 = vld [vmem:[%s4472_s9 + $0x28] sm:$0xff] }
  0x15   :  { %3085 = vmatprep.subr.mxu0 %v3512_v11  ;;  %3051 = vmatprep.subr.mxu1 %v264_v28  ;;  %v261_v31 = vld [vmem:[%s4472_s9 + $0x20] sm:$0xff]  ;;  %v260_v32 = vld [vmem:[%s4472_s9 + $0x18] sm:$0xff]  ;;  %v259_v33 = vld [vmem:[%s4472_s9 + $0x10] sm:$0xff] }
  0x16   :  { %3086 = vmatpush3.msra.mxu0 %v2775_v15  ;;  %3052 = vmatpush3.msra.mxu1 %v264_v28  ;;  %v258_v34 = vld [vmem:[%s4472_s9 + $0x8] sm:$0xff]  ;;  %v257_v35 = vld [vmem:[%s4472_s9] sm:$0xff] }
  0x17   :  { %3049 = vmatmul.mubr.msk.f32.gmra.mxu0 %vm71_vm0, %v64_v10  ;;  %3087 = vmatprep.subr.mxu0 %v3512_v11  ;;  %v2754_v36 = vld [vmem:[%s4468_s5] ss:$0 sm:$0xff] }
  0x18   :  { %3088 = vmatpush3.msra.mxu0 %v2774_v16  ;;  %3111 = vmatprep.mubr.msk.f32.mxu0 %vm3513_vm1, %v3512_v11  ;;  %v3755_v61 = vld [vmem:[%s4465_s2] sm:$0xff] }
  0x19   :  { %3089 = vmatprep.subr.mxu0 %v3512_v11  ;;  %3053 = vmatprep.subr.mxu1 %v263_v29  ;;  %v401_v8 = vsel %vm71_vm0, %v3755_v61, 0.0 }
  0x1a   :  { %3090 = vmatpush3.msra.mxu0 %v2773_v17  ;;  %3054 = vmatpush3.msra.mxu1 %v263_v29 }
  0x1b   :  { %3091 = vmatprep.subr.mxu0 %v3512_v11  ;;  %3055 = vmatprep.subr.mxu1 %v262_v30 }
  0x1c   :  { %3092 = vmatpush3.msra.mxu0 %v2772_v18  ;;  %3056 = vmatpush3.msra.mxu1 %v262_v30 }
  0x1d   :  { %3093 = vmatprep.subr.mxu0 %v3512_v11  ;;  %3057 = vmatprep.subr.mxu1 %v261_v31 }
  0x1e   :  { %3094 = vmatpush3.msra.mxu0 %v2771_v19  ;;  %3058 = vmatpush3.msra.mxu1 %v261_v31 }
  0x1f   :  { %3095 = vmatprep.subr.mxu0 %v3512_v11  ;;  %3059 = vmatprep.subr.mxu1 %v260_v32 }
  0x20   :  { %3096 = vmatpush3.msra.mxu0 %v2770_v20  ;;  %3060 = vmatpush3.msra.mxu1 %v260_v32  ;;  %v406_v20 = vshrl.u32 %v405_v12, 7 }
  0x21   :  { %3097 = vmatprep.subr.mxu0 %v3512_v11  ;;  %3061 = vmatprep.subr.mxu1 %v259_v33 }
  0x22   :  { %3098 = vmatpush3.msra.mxu0 %v2769_v21  ;;  %3062 = vmatpush3.msra.mxu1 %v259_v33  ;;  %v3778_v32 = vsub.s32 2, %v406_v20 }
  0x23   :  { %3099 = vmatprep.subr.mxu0 %v3512_v11  ;;  %3063 = vmatprep.subr.mxu1 %v258_v34 }
  0x24   :  { %3100 = vmatpush3.msra.mxu0 %v2768_v22  ;;  %3064 = vmatpush3.msra.mxu1 %v258_v34  ;;  %v422_v34 = vrot.slane %v3755_v61, %v3778_v32 }
  0x25   :  { %3101 = vmatprep.subr.mxu0 %v3512_v11  ;;  %3065 = vmatprep.subr.mxu1 %v257_v35 }
  0x26   :  { %3102 = vmatpush3.msra.mxu0 %v2767_v23  ;;  %3066 = vmatpush3.msra.mxu1 %v257_v35  ;;  %v3782_v35 = vsub.s32 0, %v406_v20 }
  0x27   :  { %3103 = vmatprep.subr.mxu0 %v3512_v11  ;;  %3114 = vmatprep.subr.mxu1 %v3512_v11 }
  0x28   :  { %3104 = vmatpush3.msra.mxu0 %v2766_v24  ;;  %402 = vadd.xlane.f32.xlu0 %v401_v8 }
  0x29   :  { %3105 = vmatprep.subr.mxu0 %v3512_v11 }
  0x2a   :  { %3106 = vmatpush3.msra.mxu0 %v2765_v25 }
  0x2b   :  { %3107 = vmatprep.subr.mxu0 %v3512_v11 }
  0x2c   :  { %3108 = vmatpush3.msra.mxu0 %v2764_v26  ;;  %v3768_v26 = vsub.s32 1, %v406_v20 }
  0x2d   :  { %3109 = vmatprep.subr.mxu0 %v3512_v11 }
  0x2e   :  { %3110 = vmatpush3.msra.mxu0 %v2763_v27  ;;  %v415_v31 = vrot.slane %v3755_v61, %v3768_v26 }
  0x2f   :  { %3149 = vmatprep.subr.mxu0 %v3512_v11 }
  0x30   :  { %417 = vbcast.lane.b32.xlu1 %v415_v31, 256 }
  0x34   :  { %424 = vbcast.lane.b32.xlu1 %v422_v34, 256 }
  0x80   :  { %v563_v37 = vpop.permute.xlu0 %562 }
  0x81   :  { %v3746_v38 = vmul.f32 %v2754_v36, %v563_v37 }
  0x83   :  { %v575_v39 = vand.u32 2139095040, %v3746_v38  ;;  %v572_v40 = vand.u32 2147483647, %v3746_v38  ;;  %vm574_vm9 = vcmp.lt.s32.totalorder %v3746_v38, 0  ;;  %vm664_vm11 = vweird.f32 %v3746_v38 }
  0x85   :  { %v576_v41 = vshrl.u32 %v575_v39, 23  ;;  %v579_v43 = vand.u32 8388607, %v572_v40  ;;  %vm573_vm10 = vcmp.le.f32.partialorder %v572_v40, 0.7853982 }
  0x87   :  { %v2755_v42 = vadd.s32 4294967169, %v576_v41  ;;  %v580_v45 = vor.u32 8388608, %v579_v43  ;;  %v408_v41 = vrot.slane %v3755_v61, %v3782_v35 }
  0x89   :  { %v582_v44 = vadd.s32 1, %v2755_v42  ;;  %v620_v60 = vshll.u32 %v580_v45, 8  ;;  %v3789_v42 = vsub.s32 3, %v406_v20  ;;  %410 = vbcast.lane.b32.xlu1 %v408_v41, 256 }
  0x8b   :  { %vm583_vm2 = vcmp.gt.s32.totalorder %v582_v44, 0  ;;  %v429_v45 = vrot.slane %v3755_v61, %v3789_v42 }
  0x8c   :  { %v584_v46 = vsel %vm583_vm2, %v582_v44, 0 }
  0x8d   :  { %v585_v47 = vshrl.u32 %v584_v46, 5  ;;  %v586_v48 = vand.u32 31, %v584_v46  ;;  %v435_v46 = vsub.s32 4, %v406_v20  ;;  %431 = vbcast.lane.b32.xlu1 %v429_v45, 256 }
  0x8f   :  { %v587_v49 = vsub.s32 32, %v586_v48  ;;  %v589_v51 = vshll.u32 %v3514_v50, %v586_v48  ;;  %v592_v53 = vshll.u32 %v3515_v52, %v586_v48  ;;  %v595_v55 = vshll.u32 %v3516_v54, %v586_v48 }
  0x90   :  { %v598_v57 = vshll.u32 %v3517_v56, %v586_v48  ;;  %v601_v59 = vshll.u32 %v3518_v58, %v586_v48  ;;  %vm604_vm3 = vcmp.lt.s32.totalorder %v585_v47, 1  ;;  %vm605_vm4 = vcmp.lt.s32.totalorder %v585_v47, 2 }
  0x91   :  { %v588_v62 = vshrl.u32 %v3514_v50, %v587_v49  ;;  %v590_v63 = vshrl.u32 %v3515_v52, %v587_v49  ;;  %v593_v0 = vshrl.u32 %v3516_v54, %v587_v49  ;;  %v596_v1 = vshrl.u32 %v3517_v56, %v587_v49 }
  0x92   :  { %v599_v2 = vshrl.u32 %v3518_v58, %v587_v49  ;;  %v602_v4 = vshrl.u32 %v3519_v3, %v587_v49  ;;  %vm607_vm5 = vcmp.lt.s32.totalorder %v585_v47, 4  ;;  %vm606_vm6 = vcmp.lt.s32.totalorder %v585_v47, 3 }
  0x93   :  { %v591_v5 = vor.u32 %v590_v63, %v589_v51  ;;  %v594_v6 = vor.u32 %v593_v0, %v592_v53  ;;  %v597_v7 = vor.u32 %v596_v1, %v595_v55  ;;  %v436_v49 = vrot.slane %v3755_v61, %v435_v46 }
  0x94   :  { %v600_v9 = vor.u32 %v599_v2, %v598_v57  ;;  %v603_v10 = vor.u32 %v602_v4, %v601_v59  ;;  %v442_v50 = vsub.s32 5, %v406_v20  ;;  %v449_v54 = vsub.s32 6, %v406_v20 }
  0x95   :  { %v608_v13 = vsel %vm604_vm3, %v588_v62, %v591_v5  ;;  %v609_v14 = vsel %vm607_vm5, %v597_v7, 2102212464  ;;  %v612_v15 = vsel %vm604_vm3, %v591_v5, %v594_v6  ;;  %v616_v16 = vsel %vm604_vm3, %v594_v6, %v597_v7  ;;  %438 = vbcast.lane.b32.xlu1 %v436_v49, 256 }
  0x96   :  { %v610_v17 = vsel %vm606_vm6, %v594_v6, %v609_v14  ;;  %v613_v18 = vsel %vm607_vm5, %v600_v9, 920167782  ;;  %v617_v19 = vsel %vm607_vm5, %v603_v10, 1326507024  ;;  %v443_v53 = vrot.slane %v3755_v61, %v442_v50 }
  0x97   :  { %v614_v21 = vsel %vm606_vm6, %v597_v7, %v613_v18  ;;  %v618_v22 = vsel %vm606_vm6, %v600_v9, %v617_v19  ;;  %v611_v23 = vsel %vm605_vm4, %v608_v13, %v610_v17  ;;  %v450_v57 = vrot.slane %v3755_v61, %v449_v54 }
  0x98   :  { %v615_v24 = vsel %vm605_vm4, %v612_v15, %v614_v21  ;;  %v619_v25 = vsel %vm605_vm4, %v616_v16, %v618_v22  ;;  %v627_v33 = vmul.u32 %v620_v60, %v611_v23  ;;  %v456_v58 = vsub.s32 7, %v406_v20  ;;  %v2728_v15 = vld [vmem:[%s4479_s16] ss:$0 sm:$0xff] }
  0x99   :  { %v3770_v27 = vmul.u32.u64.low %v620_v60, %v619_v25  ;;  %v3771_v28 = vmul.u32.u64.high %v620_v60, %v619_v25, %v3770_v27  ;;  %v3773_v29 = vmul.u32.u64.low %v620_v60, %v615_v24  ;;  %v3774_v30 = vmul.u32.u64.high %v620_v60, %v615_v24, %v3773_v29  ;;  %445 = vbcast.lane.b32.xlu1 %v443_v53, 256 }
  0x9a   :  { %v457_v1 = vrot.slane %v3755_v61, %v456_v58  ;;  %vm270_vm3 = vcmask 523264   ;;  %vm469_vm4 = vcmask 261120   ;;  %vm1380_vm5 = vcmask 1041409  }
  0x9b   :  { %vm629_vm7 = vc.u32 %v3771_v28, %v3773_v29  ;;  %v630_v36 = vadd.s32 1, %v3774_v30  ;;  %v628_v59 = vadd.s32 %v3773_v29, %v3771_v28  ;;  %vm1383_vm6 = vcmask 1042434  }
  0x9d   :  { %v631_v37 = vsel %vm629_vm7, %v630_v36, %v3774_v30  ;;  %452 = vbcast.lane.b32.xlu1 %v450_v57, 256  ;;  %vm1386_vm7 = vcmask 1043459  }
  0x9e   :  { %v632_v39 = vadd.s32 %v631_v37, %v627_v33 }
  0xa0   :  { %v633_v43 = vadd.s32 536870912, %v632_v39 }
  0xa1   :  { %459 = vbcast.lane.b32.xlu1 %v457_v1, 256 }
  0xa2   :  { %v634_v44 = vshrl.u32 %v633_v43, 30 }
  0xa4   :  { %v635_v47 = vshll.u32 %v634_v44, 30  ;;  %v658_v12 = vsub.s32 4, %v634_v44 }
  0xa6   :  { %v636_v48 = vsub.s32 %v632_v39, %v635_v47  ;;  %v659_v61 = vsel %vm574_vm9, %v658_v12, %v634_v44 }
  0xa7   :  { %v661_v18 = vsel %vm573_vm10, 0, %v659_v61 }
  0xa8   :  { %v638_v51 = vsub.s32 0, %v636_v48  ;;  %v784_v22 = vadd.s32 3, %v661_v18  ;;  %v665_v27 = vand.u32 3, %v661_v18  ;;  %v690_v18 = vld [vmem:[%s4473_s10 + $0x78] sm:$0xff] }
  0xaa   :  { %v2756_v52 = vmin.u32 %v638_v51, %v636_v48  ;;  %v785_v31 = vand.u32 3, %v784_v22  ;;  %vm666_vm12 = vcmp.lt.s32.totalorder %v665_v27, 2  ;;  %vm667_vm13 = vcmp.eq.s32.totalorder %v665_v27, 0 }
  0xab   :  { %vm670_vm0 = vcmp.eq.s32.totalorder %v665_v27, 2  ;;  %v687_v27 = vld [vmem:[%s4473_s10 + $0x60] sm:$0xff] }
  0xac   :  { %v640_v55 = vclz %v2756_v52  ;;  %vm787_vm14 = vcmp.eq.s32.totalorder %v785_v31, 0  ;;  %vm790_vm15 = vcmp.eq.s32.totalorder %v785_v31, 2  ;;  %vm786_vm2 = vcmp.lt.s32.totalorder %v785_v31, 2 }
  0xae   :  { %v2757_v56 = vadd.s32 4294967294, %v640_v55 }
  0xb0   :  { %vm2758_vm8 = vcmp.lt.s32.totalorder %v2757_v56, 0 }
  0xb1   :  { %v643_v60 = vsel %vm2758_vm8, 0, %v2757_v56  ;;  %vm1389_vm8 = vcmask 1044484  }
  0xb2   :  { %v644_v62 = vsub.s32 32, %v643_v60  ;;  %v645_v63 = vshll.u32 %v636_v48, %v643_v60  ;;  %v648_v0 = vsub.s32 4294967266, %v643_v60 }
  0xb4   :  { %v646_v2 = vshrl.u32 %v628_v59, %v644_v62  ;;  %v649_v3 = vadd.s32 127, %v648_v0 }
  0xb6   :  { %v647_v4 = vor.u32 %v646_v2, %v645_v63  ;;  %v650_v5 = vshll.u32 %v649_v3, 23 }
  0xb8   :  { %v651_v6 = vor.u32 4788187, %v650_v5  ;;  %v654_v7 = vcvt.s32.f32 %v647_v4 }
  0xba   :  { %v652_v8 = vand.u32 2147483647, %v651_v6 }
  0xbc   :  { %v655_v9 = vmul.f32 %v654_v7, %v652_v8 }
  0xbe   :  { %v656_v10 = vxor.u32 2147483648, %v655_v9 }
  0xc0   :  { %v657_v13 = vsel %vm574_vm9, %v656_v10, %v655_v9  ;;  %vm1392_vm9 = vcmask 1045509  }
  0xc1   :  { %v660_v14 = vsel %vm573_vm10, %v3746_v38, %v657_v13  ;;  %vm1395_vm10 = vcmask 1046534  }
  0xc2   :  { %3375 = vcosq.f32 %v660_v14 }
  0xc3   :  { %3377 = vsinq.f32 %v660_v14 }
  0xcb   :  { %v3041_v16 = vpop.f32.mrf.mxu0 }
  0xcc   :  { %v3805_v17 = vadd.f32 %v3041_v16, %v2728_v15 }
  0xcd   :  { %v162_v19 = vpop.f32.mrf.mxu0 }
  0xce   :  { %v2738_v20 = vmul.f32 -1.442695, %v3805_v17  ;;  %v3808_v21 = vadd.f32 %v2728_v15, %v162_v19 }
  0xcf   :  { %v3044_v40 = vpop.f32.mrf.mxu0  ;;  %v3376_v36 = vpop.eup %3375 }
  0xd0   :  { %3379 = vpow2.f32 %v2738_v20  ;;  %v2737_v23 = vmul.f32 -1.442695, %v3808_v21  ;;  %v3811_v24 = vadd.f32 %v3044_v40, %v2728_v15  ;;  %v3378_v39 = vpop.eup %3377  ;;  %v671_v44 = vxor.u32 2147483648, %v3376_v36  ;;  %v689_v40 = vld [vmem:[%s4473_s10 + $0x70] sm:$0xff] }
  0xd1   :  { %v172_v25 = vpop.f32.mrf.mxu0  ;;  %v668_v46 = vxor.u32 2147483648, %v3378_v39 }
  0xd2   :  { %3381 = vpow2.f32 %v2737_v23  ;;  %v2740_v28 = vmul.f32 -1.442695, %v3811_v24  ;;  %v3814_v29 = vadd.f32 %v2728_v15, %v172_v25  ;;  %v792_v49 = vsel %vm790_vm15, %v671_v44, %v3378_v39 }
  0xd3   :  { %v3047_v30 = vpop.f32.mrf.mxu0  ;;  %v789_v51 = vsel %vm787_vm14, %v3376_v36, %v668_v46  ;;  %v669_v52 = vsel %vm667_vm13, %v3376_v36, %v668_v46  ;;  %v672_v53 = vsel %vm670_vm0, %v671_v44, %v3378_v39  ;;  %v683_v39 = vld [vmem:[%s4473_s10 + $0x40] sm:$0xff]  ;;  %v680_v44 = vld [vmem:[%s4473_s10 + $0x28] sm:$0xff]  ;;  %v678_v46 = vld [vmem:[%s4473_s10 + $0x18] sm:$0xff]  ;;  %vm1054_vm13 = vcmask 31744  }
  0xd4   :  { %3383 = vpow2.f32 %v2740_v28  ;;  %v2739_v33 = vmul.f32 -1.442695, %v3814_v29  ;;  %v3817_v34 = vadd.f32 %v3047_v30, %v2728_v15  ;;  %v793_v56 = vsel %vm786_vm2, %v789_v51, %v792_v49  ;;  %v675_v49 = vld [vmem:[%s4473_s10] sm:$0xff]  ;;  %v967_v51 = vld [vmem:[%s4475_s12 + $0x10] sm:$0xff] }
  0xd5   :  { %v182_v37 = vpop.f32.mrf.mxu0  ;;  %v794_v57 = vsel %vm664_vm11, nan, %v793_v56  ;;  %v673_v58 = vsel %vm666_vm12, %v669_v52, %v672_v53  ;;  %v966_v52 = vld [vmem:[%s4475_s12 + $0x8] sm:$0xff]  ;;  %v965_v53 = vld [vmem:[%s4475_s12] sm:$0xff]  ;;  %vm1058_vm12 = vcmask 1043456  }
  0xd6   :  { %3385 = vpow2.f32 %v2739_v33  ;;  %v2742_v41 = vmul.f32 -1.442695, %v3817_v34  ;;  %v3821_v43 = vadd.f32 %v2728_v15, %v182_v37  ;;  %3112 = vmatmul.mubr.f32.vlgmr.msra.gmra.mxu0 %v794_v57  ;;  %v3836_v60 = vsel %vm664_vm11, nan, %v673_v58  ;;  %v685_v33 = vld [vmem:[%s4473_s10 + $0x50] sm:$0xff]  ;;  %v684_v37 = vld [vmem:[%s4473_s10 + $0x48] sm:$0xff] }
  0xd7   :  { %v3050_v45 = vpop.f32.mrf.mxu0  ;;  %3157 = vmatprep.mubr.msk.f32.mxu0 %vm3513_vm1, %v3512_v11  ;;  %vm1398_vm11 = vcmask 1047559  }
  0xd8   :  { %3387 = vpow2.f32 %v2742_v41  ;;  %v2741_v47 = vmul.f32 -1.442695, %v3821_v43  ;;  %v3824_v48 = vadd.f32 %v3050_v45, %v2728_v15  ;;  %v682_v41 = vld [vmem:[%s4473_s10 + $0x38] sm:$0xff]  ;;  %v679_v45 = vld [vmem:[%s4473_s10 + $0x20] sm:$0xff] }
  0xd9   :  { %v192_v50 = vpop.f32.mrf.mxu0 }
  0xda   :  { %3389 = vpow2.f32 %v2741_v47  ;;  %v2744_v54 = vmul.f32 -1.442695, %v3824_v48  ;;  %v3828_v55 = vadd.f32 %v2728_v15, %v192_v50  ;;  %v677_v47 = vld [vmem:[%s4473_s10 + $0x10] sm:$0xff]  ;;  %v968_v50 = vld [vmem:[%s4475_s12 + $0x18] sm:$0xff] }
  0xdb   :  { %3150 = vmatpush3.msra.mxu0 %v968_v50 }
  0xdc   :  { %3391 = vpow2.f32 %v2744_v54  ;;  %v2743_v59 = vmul.f32 -1.442695, %v3828_v55  ;;  %3151 = vmatprep.subr.mxu0 %v3512_v11  ;;  %v418_v54 = vpop.permute.xlu1 %417 }
  0xdd   :  { %v3380_v62 = vpop.eup %3379  ;;  %3152 = vmatpush3.msra.mxu0 %v967_v51 }
  0xde   :  { %v226_v63 = vadd.f32 1.0, %v3380_v62  ;;  %3393 = vpow2.f32 %v2743_v59  ;;  %3153 = vmatprep.subr.mxu0 %v3512_v11 }
  0xdf   :  { %v3382_v0 = vpop.eup %3381  ;;  %3154 = vmatpush3.msra.mxu0 %v966_v52 }
  0xe0   :  { %v225_v1 = vadd.f32 1.0, %v3382_v0  ;;  %3395 = vrcp.f32 %v226_v63  ;;  %3155 = vmatprep.subr.mxu0 %v3512_v11  ;;  %v3946_v0 = vld [vmem:[%s4479_s16 + $0x1] ss:$0 sm:$0xff] }
  0xe1   :  { %v3384_v2 = vpop.eup %3383  ;;  %3156 = vmatpush3.msra.mxu0 %v965_v53 }
  0xe2   :  { %3397 = vrcp.f32 %v225_v1  ;;  %v228_v3 = vadd.f32 1.0, %v3384_v2  ;;  %3160 = vmatprep.subr.mxu0 %v3512_v11 }
  0xe3   :  { %v3386_v4 = vpop.eup %3385 }
  0xe4   :  { %v227_v5 = vadd.f32 1.0, %v3386_v4  ;;  %3399 = vrcp.f32 %v228_v3 }
  0xe5   :  { %v3388_v6 = vpop.eup %3387 }
  0xe6   :  { %3401 = vrcp.f32 %v227_v5  ;;  %v230_v38 = vadd.f32 1.0, %v3388_v6 }
  0xe7   :  { %v3390_v7 = vpop.eup %3389 }
  0xe8   :  { %v229_v8 = vadd.f32 1.0, %v3390_v7  ;;  %3403 = vrcp.f32 %v230_v38 }
  0xe9   :  { %v3392_v9 = vpop.eup %3391 }
  0xea   :  { %3405 = vrcp.f32 %v229_v8  ;;  %v232_v10 = vadd.f32 1.0, %v3392_v9 }
  0xeb   :  { %v3394_v12 = vpop.eup %3393 }
  0xec   :  { %v231_v13 = vadd.f32 1.0, %v3394_v12  ;;  %3407 = vrcp.f32 %v232_v10 }
  0xed   :  { %v3396_v14 = vpop.eup %3395 }
  0xee   :  { %3409 = vrcp.f32 %v231_v13  ;;  %v250_v16 = vmul.f32 %v3396_v14, %v3805_v17  ;;  %v688_v17 = vld [vmem:[%s4473_s10 + $0x68] sm:$0xff] }
  0xef   :  { %v3398_v61 = vpop.eup %3397 }
  0xf0   :  { %v249_v15 = vmul.f32 %v3398_v61, %v3808_v21 }
  0xf1   :  { %v3400_v19 = vpop.eup %3399 }
  0xf2   :  { %3067 = vmatprep.mubr.msk.f32.mxu1 %vm270_vm3, %v249_v15  ;;  %v252_v21 = vmul.f32 %v3400_v19, %v3811_v24 }
  0xf3   :  { %v3402_v20 = vpop.eup %3401  ;;  %3068 = vmatmul.mubr.msk.f32.vlgmr.msra.gmra.mxu1 %vm270_vm3, %v250_v16 }
  0xf4   :  { %v251_v22 = vmul.f32 %v3402_v20, %v3814_v29  ;;  %3115 = vmatpush3.msra.mxu1 %v690_v18  ;;  %v686_v29 = vld [vmem:[%s4473_s10 + $0x58] sm:$0xff] }
  0xf5   :  { %3116 = vmatprep.subr.mxu1 %v3512_v11  ;;  %v3404_v23 = vpop.eup %3403 }
  0xf6   :  { %3117 = vmatpush3.msra.mxu1 %v689_v40  ;;  %3070 = vmatprep.mubr.msk.f32.mxu1 %vm270_vm3, %v251_v22  ;;  %v254_v28 = vmul.f32 %v3404_v23, %v3817_v34 }
  0xf7   :  { %v3406_v25 = vpop.eup %3405  ;;  %3118 = vmatprep.subr.mxu1 %v3512_v11  ;;  %3071 = vmatmul.mubr.msk.f32.gmra.mxu1 %vm270_vm3, %v252_v21 }
  0xf8   :  { %v253_v24 = vmul.f32 %v3406_v25, %v3821_v43  ;;  %3119 = vmatpush3.msra.mxu1 %v688_v17  ;;  %v681_v43 = vld [vmem:[%s4473_s10 + $0x30] sm:$0xff] }
  0xf9   :  { %3120 = vmatprep.subr.mxu1 %v3512_v11  ;;  %v3408_v30 = vpop.eup %3407 }
  0xfa   :  { %3121 = vmatpush3.msra.mxu1 %v687_v27  ;;  %3073 = vmatprep.mubr.msk.f32.mxu1 %vm270_vm3, %v253_v24  ;;  %v256_v36 = vmul.f32 %v3408_v30, %v3824_v48  ;;  %v676_v48 = vld [vmem:[%s4473_s10 + $0x8] sm:$0xff] }
  0xfb   :  { %v3410_v31 = vpop.eup %3409  ;;  %3122 = vmatprep.subr.mxu1 %v3512_v11  ;;  %3074 = vmatmul.mubr.msk.f32.gmra.mxu1 %vm270_vm3, %v254_v28 }
  0xfc   :  { %v255_v34 = vmul.f32 %v3410_v31, %v3828_v55  ;;  %3123 = vmatpush3.msra.mxu1 %v686_v29  ;;  %v425_v55 = vpop.permute.xlu1 %424 }
  0xfd   :  { %3124 = vmatprep.subr.mxu1 %v3512_v11 }
  0xfe   :  { %3125 = vmatpush3.msra.mxu1 %v685_v33  ;;  %3076 = vmatprep.mubr.msk.f32.mxu1 %vm270_vm3, %v255_v34 }
  0xff   :  { %3126 = vmatprep.subr.mxu1 %v3512_v11  ;;  %3077 = vmatmul.mubr.msk.f32.gmra.mxu1 %vm270_vm3, %v256_v36 }
 0x100   :  { %3127 = vmatpush3.msra.mxu1 %v684_v37  ;;  %3146 = vmatprep.mubr.msk.f32.mxu1 %vm3513_vm1, %v3512_v11  ;;  %v411_v58 = vpop.permute.xlu1 %410 }
 0x101   :  { %3128 = vmatprep.subr.mxu1 %v3512_v11 }
 0x102   :  { %3129 = vmatpush3.msra.mxu1 %v683_v39 }
 0x103   :  { %3130 = vmatprep.subr.mxu1 %v3512_v11 }
 0x104   :  { %3131 = vmatpush3.msra.mxu1 %v682_v41  ;;  %v432_v59 = vpop.permute.xlu1 %431 }
 0x105   :  { %3132 = vmatprep.subr.mxu1 %v3512_v11 }
 0x106   :  { %3133 = vmatpush3.msra.mxu1 %v681_v43 }
 0x107   :  { %3134 = vmatprep.subr.mxu1 %v3512_v11 }
 0x108   :  { %3135 = vmatpush3.msra.mxu1 %v680_v44  ;;  %v439_v63 = vpop.permute.xlu1 %438 }
 0x109   :  { %3136 = vmatprep.subr.mxu1 %v3512_v11 }
 0x10a   :  { %3137 = vmatpush3.msra.mxu1 %v679_v45 }
 0x10b   :  { %3138 = vmatprep.subr.mxu1 %v3512_v11 }
 0x10c   :  { %3139 = vmatpush3.msra.mxu1 %v678_v46  ;;  %v446_v4 = vpop.permute.xlu1 %445 }
 0x10d   :  { %3140 = vmatprep.subr.mxu1 %v3512_v11 }
 0x10e   :  { %3141 = vmatpush3.msra.mxu1 %v677_v47 }
 0x10f   :  { %3142 = vmatprep.subr.mxu1 %v3512_v11 }
 0x110   :  { %3143 = vmatpush3.msra.mxu1 %v676_v48  ;;  %v453_v18 = vpop.permute.xlu1 %452 }
 0x111   :  { %3144 = vmatprep.subr.mxu1 %v3512_v11 }
 0x112   :  { %3145 = vmatpush3.msra.mxu1 %v675_v49 }
 0x113   :  { %3147 = vmatmul.mubr.f32.vlgmr.msra.gmra.mxu1 %v3836_v60  ;;  %3184 = vmatprep.subr.mxu1 %v3512_v11  ;;  %v403_v60 = vpop.xlane.xlu0 %402 }
 0x114   :  { %3192 = vmatprep.mubr.msk.f32.mxu1 %vm3513_vm1, %v3512_v11  ;;  %v404_v62 = vmax.f32 %v403_v60, 1e-06  ;;  %v460_v46 = vpop.permute.xlu1 %459 }
 0x116   :  { %v527_v1 = vrot.slane %v404_v62, 1  ;;  %v529_v3 = vrot.slane %v404_v62, 3  ;;  %v528_v38 = vrot.slane %v404_v62, 2  ;;  %v531_v10 = vrot.slane %v404_v62, 5 }
 0x117   :  { %v530_v61 = vrot.slane %v404_v62, 4  ;;  %v533_v19 = vrot.slane %v404_v62, 7  ;;  %v532_v21 = vrot.slane %v404_v62, 6 }
 0x118   :  { %3411 = vrcp.f32 %v527_v1 }
 0x119   :  { %3413 = vrcp.f32 %v404_v62 }
 0x11a   :  { %3415 = vrcp.f32 %v529_v3 }
 0x11b   :  { %3417 = vrcp.f32 %v528_v38 }
 0x11c   :  { %3419 = vrcp.f32 %v531_v10 }
 0x11d   :  { %3421 = vrcp.f32 %v530_v61 }
 0x11e   :  { %3423 = vrcp.f32 %v533_v19 }
 0x11f   :  { %3425 = vrcp.f32 %v532_v21 }
 0x196   :  { %v3941_v56 = vpop.f32.mrf.mxu0 }
 0x198   :  { %v3113_v57 = vpop.f32.mrf.mxu0 }
 0x1b3   :  { %v3069_v2 = vpop.f32.mrf.mxu1 }
 0x1b4   :  { %v367_v5 = vadd.f32 %v3069_v2, %v3946_v0 }
 0x1b5   :  { %v361_v6 = vpop.f32.mrf.mxu1 }
 0x1b6   :  { %v462_v7 = vmul.f32 %v418_v54, %v367_v5  ;;  %v362_v8 = vadd.f32 %v3946_v0, %v361_v6 }
 0x1b7   :  { %v3072_v9 = vpop.f32.mrf.mxu1 }
 0x1b8   :  { %v477_v12 = vsel %vm469_vm4, %v462_v7, 0.0  ;;  %v461_v13 = vmul.f32 %v411_v58, %v362_v8  ;;  %v377_v14 = vadd.f32 %v3072_v9, %v3946_v0 }
 0x1b9   :  { %v478_v15 = vrot.slane %v477_v12, 4  ;;  %v371_v16 = vpop.f32.mrf.mxu1 }
 0x1ba   :  { %v470_v20 = vsel %vm469_vm4, %v461_v13, 0.0  ;;  %v464_v40 = vmul.f32 %v432_v59, %v377_v14  ;;  %v372_v22 = vadd.f32 %v3946_v0, %v371_v16 }
 0x1bb   :  { %v479_v17 = vadd.f32 %v478_v15, %v477_v12  ;;  %v471_v23 = vrot.slane %v470_v20, 4  ;;  %v3075_v25 = vpop.f32.mrf.mxu1 }
 0x1bc   :  { %v491_v27 = vsel %vm469_vm4, %v464_v40, 0.0  ;;  %v463_v24 = vmul.f32 %v425_v55, %v372_v22  ;;  %v387_v28 = vadd.f32 %v3075_v25, %v3946_v0  ;;  %v3412_v55 = vpop.eup %3411 }
 0x1bd   :  { %v480_v29 = vrot.slane %v479_v17, 2  ;;  %v472_v30 = vadd.f32 %v471_v23, %v470_v20  ;;  %v492_v31 = vrot.slane %v491_v27, 4  ;;  %v381_v33 = vpop.f32.mrf.mxu1  ;;  %v3414_v62 = vpop.eup %3413 }
 0x1be   :  { %v484_v34 = vsel %vm469_vm4, %v463_v24, 0.0  ;;  %v466_v36 = vmul.f32 %v446_v4, %v387_v28  ;;  %v382_v37 = vadd.f32 %v3946_v0, %v381_v33 }
 0x1bf   :  { %v481_v39 = vadd.f32 %v480_v29, %v479_v17  ;;  %v473_v41 = vrot.slane %v472_v30, 2  ;;  %v493_v43 = vadd.f32 %v492_v31, %v491_v27  ;;  %v485_v44 = vrot.slane %v484_v34, 4  ;;  %v3078_v45 = vpop.f32.mrf.mxu1 }
 0x1c0   :  { %v505_v47 = vsel %vm469_vm4, %v466_v36, 0.0  ;;  %v465_v48 = vmul.f32 %v439_v63, %v382_v37  ;;  %v397_v49 = vadd.f32 %v3078_v45, %v3946_v0  ;;  %v3416_v63 = vpop.eup %3415 }
 0x1c1   :  { %v482_v50 = vrot.slane %v481_v39, 1  ;;  %v474_v51 = vadd.f32 %v473_v41, %v472_v30  ;;  %v494_v52 = vrot.slane %v493_v43, 2  ;;  %v486_v53 = vadd.f32 %v485_v44, %v484_v34  ;;  %v391_v54 = vpop.f32.mrf.mxu1  ;;  %v3418_v13 = vpop.eup %3417 }
 0x1c2   :  { %v506_v57 = vrot.slane %v505_v47, 4  ;;  %v498_v58 = vsel %vm469_vm4, %v465_v48, 0.0  ;;  %v468_v59 = vmul.f32 %v460_v46, %v397_v49  ;;  %v392_v60 = vadd.f32 %v3946_v0, %v391_v54  ;;  %v3420_v22 = vpop.eup %3419 }
 0x1c3   :  { %v483_v1 = vadd.f32 %v482_v50, %v481_v39  ;;  %v475_v2 = vrot.slane %v474_v51, 1  ;;  %v495_v3 = vadd.f32 %v494_v52, %v493_v43  ;;  %v487_v4 = vrot.slane %v486_v53, 2  ;;  %v3422_v25 = vpop.eup %3421 }
 0x1c4   :  { %v507_v5 = vadd.f32 %v506_v57, %v505_v47  ;;  %v499_v6 = vrot.slane %v498_v58, 4  ;;  %v519_v38 = vsel %vm469_vm4, %v468_v59, 0.0  ;;  %v467_v7 = vmul.f32 %v453_v18, %v392_v60  ;;  %v3424_v29 = vpop.eup %3423 }
 0x1c5   :  { %v3963_v8 = vmul.f32 %v3412_v55, %v483_v1  ;;  %v476_v9 = vadd.f32 %v475_v2, %v474_v51  ;;  %v496_v10 = vrot.slane %v495_v3, 1  ;;  %v488_v12 = vadd.f32 %v487_v4, %v486_v53  ;;  %v3426_v36 = vpop.eup %3425 }
 0x1c6   :  { %v508_v14 = vrot.slane %v507_v5, 2  ;;  %v500_v61 = vadd.f32 %v499_v6, %v498_v58  ;;  %v520_v0 = vrot.slane %v519_v38, 4  ;;  %v512_v15 = vsel %vm469_vm4, %v467_v7, 0.0 }
 0x1c7   :  { %v2798_v16 = vmul.f32 -1.442695, %v3963_v8  ;;  %v2299_v19 = vrot.slane %v3963_v8, 7  ;;  %v3968_v20 = vmul.f32 %v3414_v62, %v476_v9  ;;  %v497_v40 = vadd.f32 %v496_v10, %v495_v3 }
 0x1c8   :  { %v489_v18 = vrot.slane %v488_v12, 1  ;;  %v509_v21 = vadd.f32 %v508_v14, %v507_v5  ;;  %v501_v17 = vrot.slane %v500_v61, 2  ;;  %v521_v23 = vadd.f32 %v520_v0, %v519_v38 }
 0x1c9   :  { %3427 = vpow2.f32 %v2798_v16  ;;  %v2797_v27 = vmul.f32 -1.442695, %v3968_v20  ;;  %v2300_v24 = vsel %vm1380_vm5, %v2299_v19, %v3968_v20  ;;  %v3973_v28 = vmul.f32 %v3416_v63, %v497_v40  ;;  %v2779_v63 = vld [vmem:[%s4479_s16 + $0x6] ss:$0 sm:$0xff] }
 0x1ca   :  { %v490_v30 = vadd.f32 %v489_v18, %v488_v12  ;;  %v510_v31 = vrot.slane %v509_v21, 1  ;;  %v502_v33 = vadd.f32 %v501_v17, %v500_v61  ;;  %v522_v34 = vrot.slane %v521_v23, 2 }
 0x1cb   :  { %3429 = vpow2.f32 %v2797_v27  ;;  %v2800_v37 = vmul.f32 -1.442695, %v3973_v28  ;;  %v513_v39 = vrot.slane %v512_v15, 4  ;;  %v2303_v51 = vrot.slane %v3973_v28, 5 }
 0x1cc   :  { %v3976_v41 = vmul.f32 %v3418_v13, %v490_v30  ;;  %v511_v43 = vadd.f32 %v510_v31, %v509_v21  ;;  %v503_v44 = vrot.slane %v502_v33, 1  ;;  %v523_v45 = vadd.f32 %v522_v34, %v521_v23 }
 0x1cd   :  { %3431 = vpow2.f32 %v2800_v37  ;;  %v514_v46 = vadd.f32 %v513_v39, %v512_v15 }
 0x1ce   :  { %v2799_v47 = vmul.f32 -1.442695, %v3976_v41  ;;  %v2301_v48 = vrot.slane %v3976_v41, 6  ;;  %v3980_v49 = vmul.f32 %v3420_v22, %v511_v43  ;;  %v504_v50 = vadd.f32 %v503_v44, %v502_v33 }
 0x1cf   :  { %v524_v52 = vrot.slane %v523_v45, 1  ;;  %v515_v53 = vrot.slane %v514_v46, 2 }
 0x1d0   :  { %3433 = vpow2.f32 %v2799_v47  ;;  %v2802_v54 = vmul.f32 -1.442695, %v3980_v49  ;;  %v3984_v55 = vmul.f32 %v3422_v25, %v504_v50  ;;  %v2302_v57 = vsel %vm1383_vm6, %v2301_v48, %v2300_v24 }
 0x1d1   :  { %v525_v58 = vadd.f32 %v524_v52, %v523_v45  ;;  %v516_v59 = vadd.f32 %v515_v53, %v514_v46  ;;  %v2304_v60 = vsel %vm1386_vm7, %v2303_v51, %v2302_v57  ;;  %v2307_v5 = vrot.slane %v3980_v49, 3 }
 0x1d2   :  { %3435 = vpow2.f32 %v2802_v54  ;;  %v2801_v62 = vmul.f32 -1.442695, %v3984_v55  ;;  %v2305_v1 = vrot.slane %v3984_v55, 4 }
 0x1d3   :  { %v3990_v2 = vmul.f32 %v3424_v29, %v525_v58  ;;  %v517_v3 = vrot.slane %v516_v59, 1  ;;  %v948_v4 = vpop.f32.mrf.mxu1 }
 0x1d4   :  { %3437 = vpow2.f32 %v2801_v62  ;;  %v949_v6 = vadd.f32 %v948_v4, %v3941_v56  ;;  %v2306_v38 = vsel %vm1389_vm8, %v2305_v1, %v2304_v60 }
 0x1d5   :  { %v2804_v7 = vmul.f32 -1.442695, %v3990_v2  ;;  %v518_v9 = vadd.f32 %v517_v3, %v516_v59  ;;  %v3148_v10 = vpop.f32.mrf.mxu1  ;;  %v2308_v12 = vsel %vm1392_vm9, %v2307_v5, %v2306_v38  ;;  %v2311_v18 = vrot.slane %v3990_v2, 1 }
 0x1d6   :  { %v3428_v13 = vpop.eup %3427  ;;  %v4000_v14 = vadd.f32 %v2779_v63, %v949_v6 }
 0x1d7   :  { %v1251_v61 = vadd.f32 1.0, %v3428_v13  ;;  %3439 = vpow2.f32 %v2804_v7  ;;  %v4002_v0 = vmul.f32 %v3426_v36, %v518_v9  ;;  %v1047_v9 = vld [vmem:[%s4466_s3] sm:$0xff] }
 0x1d8   :  { %v3430_v15 = vpop.eup %3429  ;;  %v2780_v16 = vmul.f32 -1.442695, %v4000_v14 }
 0x1d9   :  { %3441 = vrcp.f32 %v1251_v61  ;;  %v1250_v56 = vadd.f32 1.0, %v3430_v15  ;;  %v2803_v19 = vmul.f32 -1.442695, %v4002_v0  ;;  %v2309_v40 = vrot.slane %v4002_v0, 2  ;;  %v2793_v61 = vld [vmem:[%s4472_s9 + $0xb0] sm:$0xff]  ;;  %v2791_v15 = vld [vmem:[%s4472_s9 + $0xa0] sm:$0xff] }
 0x1da   :  { %v3432_v22 = vpop.eup %3431  ;;  %3443 = vpow2.f32 %v2780_v16  ;;  %v2790_v16 = vld [vmem:[%s4472_s9 + $0x98] sm:$0xff] }
 0x1db   :  { %3445 = vrcp.f32 %v1250_v56  ;;  %v1253_v21 = vadd.f32 1.0, %v3432_v22  ;;  %v2310_v17 = vsel %vm1395_vm10, %v2309_v40, %v2308_v12  ;;  %v2789_v56 = vld [vmem:[%s4472_s9 + $0x90] sm:$0xff]  ;;  %v2787_v40 = vld [vmem:[%s4472_s9 + $0x80] sm:$0xff] }
 0x1dc   :  { %3447 = vpow2.f32 %v2803_v19  ;;  %v4010_v23 = vsel %vm1398_vm11, %v2311_v18, %v2310_v17  ;;  %v2788_v19 = vld [vmem:[%s4472_s9 + $0x88] sm:$0xff]  ;;  %v1564_v22 = vld [vmem:[%s4485_s6] sm:$0xff] }
 0x1dd   :  { %v3434_v25 = vpop.eup %3433  ;;  %3449 = vrcp.f32 %v1253_v21  ;;  %1568 = vperm.xlu1 %3374, %v1564_v22   ;;  %v2781_v18 = vld [vmem:[%s4479_s16 + $0x7] ss:$0 sm:$0xff] }
 0x1de   :  { %v1252_v27 = vadd.f32 1.0, %v3434_v25  ;;  %v2783_v25 = vld [vmem:[%s4479_s16 + $0x4] ss:$0 sm:$0xff] }
 0x1df   :  { %v3436_v24 = vpop.eup %3435  ;;  %v2822_v22 = vld [vmem:[%s4472_s9 + $0x40] sm:$0xff] }
 0x1e0   :  { %3451 = vrcp.f32 %v1252_v27  ;;  %v1255_v29 = vadd.f32 1.0, %v3436_v24 }
 0x1e1   :  { %v3438_v30 = vpop.eup %3437 }
 0x1e2   :  { %3453 = vrcp.f32 %v1255_v29  ;;  %v1254_v31 = vadd.f32 1.0, %v3438_v30 }
 0x1e4   :  { %v3440_v33 = vpop.eup %3439  ;;  %3455 = vrcp.f32 %v1254_v31 }
 0x1e5   :  { %v1257_v34 = vadd.f32 1.0, %v3440_v33 }
 0x1e6   :  { %v3442_v36 = vpop.eup %3441 }
 0x1e7   :  { %v3444_v37 = vpop.eup %3443  ;;  %v1275_v39 = vmul.f32 %v3442_v36, %v3963_v8  ;;  %3457 = vrcp.f32 %v1257_v34 }
 0x1e8   :  { %v3446_v43 = vpop.eup %3445  ;;  %v961_v44 = vadd.f32 1.0, %v3444_v37 }
 0x1e9   :  { %v3448_v45 = vpop.eup %3447  ;;  %v1379_v46 = vrot.slane %v1275_v39, 7  ;;  %v1274_v47 = vmul.f32 %v3446_v43, %v3968_v20 }
 0x1ea   :  { %v3450_v48 = vpop.eup %3449  ;;  %v1256_v50 = vadd.f32 1.0, %v3448_v45  ;;  %3459 = vrcp.f32 %v961_v44  ;;  %v2816_v45 = vld [vmem:[%s4474_s11 + $0x58] sm:$0xff] }
 0x1eb   :  { %v1381_v51 = vsel %vm1380_vm5, %v1379_v46, %v1274_v47  ;;  %v1277_v53 = vmul.f32 %v3450_v48, %v3973_v28  ;;  %v2815_v46 = vld [vmem:[%s4474_s11 + $0x50] sm:$0xff]  ;;  %v2814_v47 = vld [vmem:[%s4474_s11 + $0x48] sm:$0xff] }
 0x1ec   :  { %3461 = vrcp.f32 %v1256_v50  ;;  %v2813_v50 = vld [vmem:[%s4474_s11 + $0x40] sm:$0xff] }
 0x1ed   :  { %v3452_v52 = vpop.eup %3451  ;;  %v1385_v59 = vrot.slane %v1277_v53, 5  ;;  %v2808_v53 = vld [vmem:[%s4474_s11 + $0x30] sm:$0xff] }
 0x1ee   :  { %v1276_v54 = vmul.f32 %v3452_v52, %v3976_v41  ;;  %v2809_v52 = vld [vmem:[%s4474_s11 + $0x38] sm:$0xff] }
 0x1ef   :  { %v3454_v57 = vpop.eup %3453  ;;  %3185 = vmatpush3.msra.mxu1 %v2809_v52 }
 0x1f0   :  { %v1382_v8 = vrot.slane %v1276_v54, 6  ;;  %v1279_v60 = vmul.f32 %v3454_v57, %v3980_v49  ;;  %v1048_v49 = vld [vmem:[%s4471_s8] sm:$0xf]  ;;  %3186 = vmatprep.subr.mxu1 %v3512_v11  ;;  %v2807_v54 = vld [vmem:[%s4474_s11 + $0x28] sm:$0xff] }
 0x1f1   :  { %v3456_v58 = vpop.eup %3455  ;;  %3187 = vmatpush3.msra.mxu1 %v2808_v53  ;;  %v2806_v57 = vld [vmem:[%s4474_s11 + $0x20] sm:$0xff] }
 0x1f2   :  { %v1278_v20 = vmul.f32 %v3456_v58, %v3984_v55  ;;  %v1384_v62 = vsel %vm1383_vm6, %v1382_v8, %v1381_v51  ;;  %v1391_v4 = vrot.slane %v1279_v60, 3  ;;  %3188 = vmatprep.subr.mxu1 %v3512_v11  ;;  %v2795_v8 = vld [vmem:[%s4479_s16 + $0x5] ss:$0 sm:$0xff] }
 0x1f3   :  { %v1387_v1 = vsel %vm1386_vm7, %v1385_v59, %v1384_v62  ;;  %3189 = vmatpush3.msra.mxu1 %v2807_v54  ;;  %v2819_v62 = vld [vmem:[%s4470_s7] ss:$0 sm:$0xff]  ;;  %v1717_v54 = vld [vmem:[%s4477_s14 + $0x18] sm:$0xff]  ;;  %s3522_s7 = smov [#allocation2]  }
 0x1f4   :  { %v1388_v3 = vrot.slane %v1278_v20, 4  ;;  %v3458_v63 = vpop.eup %3457  ;;  %3190 = vmatprep.subr.mxu1 %v3512_v11 }
 0x1f5   :  { %v1281_v38 = vmul.f32 %v3458_v63, %v3990_v2  ;;  %3191 = vmatpush3.msra.mxu1 %v2806_v57  ;;  %v1716_v57 = vld [vmem:[%s4477_s14 + $0x10] sm:$0xff] }
 0x1f6   :  { %v1390_v5 = vsel %vm1389_vm8, %v1388_v3, %v1387_v1  ;;  %3195 = vmatprep.subr.mxu1 %v3512_v11 }
 0x1f7   :  { %v3460_v28 = vpop.eup %3459  ;;  %v1393_v41 = vsel %vm1392_vm9, %v1391_v4, %v1390_v5  ;;  %v1397_v12 = vrot.slane %v1281_v38, 1  ;;  %v2820_v5 = vld [vmem:[%s4479_s16 + $0x2] ss:$0 sm:$0xff] }
 0x1f8   :  { %v964_v6 = vmul.f32 %v3460_v28, %v4000_v14  ;;  %v2794_v14 = vld [vmem:[%s4472_s9 + $0xb8] sm:$0xff] }
 0x1f9   :  { %v3462_v55 = vpop.eup %3461 }
 0x1fa   :  { %3158 = vmatmul.mubr.msk.f32.vlgmr.msra.gmra.mxu0 %vm469_vm4, %v964_v6  ;;  %v1280_v7 = vmul.f32 %v3462_v55, %v4002_v0  ;;  %v2792_v0 = vld [vmem:[%s4472_s9 + $0xa8] sm:$0xff] }
 0x1fb   :  { %3161 = vmatpush3.msk.msra.mxu0 %vm1058_vm12, %v1048_v49  ;;  %3162 = vmatprep.mubr.msk.f32.mxu0 %vm3513_vm1, %v3512_v11 }
 0x1fc   :  { %3165 = vmatprep.subr.mxu0 %v3512_v11  ;;  %v1394_v10 = vrot.slane %v1280_v7, 2  ;;  %v1285_v7 = vld [vmem:[%s4474_s11 + $0x18] sm:$0xff] }
 0x1fe   :  { %3163 = vmatmul.mubr.msk.f32.vlgmr.msra.gmra.mxu0 %vm1054_vm13, %v1047_v9  ;;  %v1396_v2 = vsel %vm1395_vm10, %v1394_v10, %v1393_v41  ;;  %v1284_v10 = vld [vmem:[%s4474_s11 + $0x10] sm:$0xff] }
 0x1ff   :  { %3181 = vmatprep.mubr.msk.f32.mxu0 %vm3513_vm1, %v3512_v11  ;;  %v4040_v13 = vsel %vm1398_vm11, %v1397_v12, %v1396_v2  ;;  %3166 = vmatpush3.msra.mxu0 %v2794_v14  ;;  %v1283_v2 = vld [vmem:[%s4474_s11 + $0x8] sm:$0xff]  ;;  %v1282_v14 = vld [vmem:[%s4474_s11] sm:$0xff] }
 0x200   :  { %3167 = vmatprep.subr.mxu0 %v3512_v11 }
 0x201   :  { %3168 = vmatpush3.msra.mxu0 %v2793_v61  ;;  %v2829_v61 = vld [vmem:[%s4472_s9 + $0x78] sm:$0xff] }
 0x202   :  { %3169 = vmatprep.subr.mxu0 %v3512_v11 }
 0x203   :  { %3170 = vmatpush3.msra.mxu0 %v2792_v0  ;;  %v2828_v0 = vld [vmem:[%s4472_s9 + $0x70] sm:$0xff] }
 0x204   :  { %3171 = vmatprep.subr.mxu0 %v3512_v11 }
 0x205   :  { %3172 = vmatpush3.msra.mxu0 %v2791_v15  ;;  %v2827_v15 = vld [vmem:[%s4472_s9 + $0x68] sm:$0xff] }
 0x206   :  { %3173 = vmatprep.subr.mxu0 %v3512_v11 }
 0x207   :  { %3174 = vmatpush3.msra.mxu0 %v2790_v16  ;;  %v2825_v16 = vld [vmem:[%s4472_s9 + $0x58] sm:$0xff] }
 0x208   :  { %3175 = vmatprep.subr.mxu0 %v3512_v11 }
 0x209   :  { %3176 = vmatpush3.msra.mxu0 %v2789_v56  ;;  %v2824_v56 = vld [vmem:[%s4472_s9 + $0x50] sm:$0xff] }
 0x20a   :  { %3177 = vmatprep.subr.mxu0 %v3512_v11 }
 0x20b   :  { %3178 = vmatpush3.msra.mxu0 %v2788_v19  ;;  %v2823_v19 = vld [vmem:[%s4472_s9 + $0x48] sm:$0xff] }
 0x20c   :  { %3179 = vmatprep.subr.mxu0 %v3512_v11 }
 0x20d   :  { %3180 = vmatpush3.msra.mxu0 %v2787_v40 }
 0x20e   :  { %3206 = vmatprep.subr.mxu0 %v3512_v11 }
 0x258   :  { %v1569_v1 = vpop.permute.xlu1 %1568 }
 0x259   :  { %v1577_v63 = vmul.f32 %v2819_v62, %v1569_v1 }
 0x25b   :  { %v1583_v28 = vadd.f32 %v2820_v5, %v1577_v63 }
 0x25d   :  { %v2821_v6 = vmul.f32 -1.442695, %v1583_v28 }
 0x2ba   :  { %v1043_v21 = vpop.f32.mrf.mxu0 }
 0x2bb   :  { %v4083_v27 = vadd.f32 %v2781_v18, %v1043_v21 }
 0x2bc   :  { %v3159_v17 = vpop.f32.mrf.mxu0 }
 0x2bd   :  { %v2812_v31 = vmul.f32 -1.442695, %v4083_v27 }
 0x2be   :  { %v1128_v24 = vpop.f32.mrf.mxu0 }
 0x2bf   :  { %v1129_v29 = vadd.f32 %v2783_v25, %v1128_v24 }
 0x2c0   :  { %v3164_v30 = vpop.f32.mrf.mxu0 }
 0x2c1   :  { %v2786_v33 = vmul.f32 -1.442695, %v1129_v29  ;;  %v2818_v30 = vld [vmem:[%s4479_s16 + $0x8] ss:$0 sm:$0xff] }
 0x2c3   :  { %3463 = vpow2.f32 %v2786_v33 }
 0x2c4   :  { %3465 = vpow2.f32 %v2812_v31 }
 0x2d0   :  { %v3464_v34 = vpop.eup %3463 }
 0x2d1   :  { %v1135_v36 = vadd.f32 1.0, %v3464_v34  ;;  %v3466_v37 = vpop.eup %3465  ;;  %v2830_v34 = vld [vmem:[%s4479_s16 + $0x3] ss:$0 sm:$0xff] }
 0x2d2   :  { %v1475_v39 = vadd.f32 1.0, %v3466_v37 }
 0x2d3   :  { %3467 = vrcp.f32 %v1135_v36 }
 0x2d4   :  { %3469 = vrcp.f32 %v1475_v39 }
 0x2e0   :  { %v3468_v43 = vpop.eup %3467 }
 0x2e1   :  { %v1138_v44 = vmul.f32 %v3468_v43, %v1129_v29  ;;  %v3470_v48 = vpop.eup %3469 }
 0x2e2   :  { %v1478_v51 = vmul.f32 %v3470_v48, %v4083_v27 }
 0x2e3   :  { %3182 = vmatmul.mubr.msk.f32.vlgmr.msra.gmra.mxu0 %vm270_vm3, %v1138_v44 }
 0x2e4   :  { %3207 = vmatpush3.msra.mxu0 %v2816_v45  ;;  %3214 = vmatprep.mubr.msk.f32.mxu0 %vm3513_vm1, %v3512_v11 }
 0x2e5   :  { %3208 = vmatprep.subr.mxu0 %v3512_v11 }
 0x2e6   :  { %3209 = vmatpush3.msra.mxu0 %v2815_v46 }
 0x2e7   :  { %3210 = vmatprep.subr.mxu0 %v3512_v11 }
 0x2e8   :  { %3211 = vmatpush3.msra.mxu0 %v2814_v47 }
 0x2e9   :  { %3212 = vmatprep.subr.mxu0 %v3512_v11 }
 0x2ea   :  { %3213 = vmatpush3.msra.mxu0 %v2813_v50 }
 0x2eb   :  { %3215 = vmatmul.mubr.msk.f32.vlgmr.msra.gmra.mxu0 %vm469_vm4, %v1478_v51  ;;  %3236 = vmatprep.subr.mxu0 %v3512_v11 }
 0x2ec   :  { %3244 = vmatprep.mubr.msk.f32.mxu0 %vm3513_vm1, %v3512_v11  ;;  %3237 = vmatpush3.msra.mxu0 %v1717_v54 }
 0x2ed   :  { %3238 = vmatprep.subr.mxu0 %v3512_v11 }
 0x2ee   :  { %3239 = vmatpush3.msra.mxu0 %v1716_v57 }
 0x2ef   :  { %3240 = vmatprep.subr.mxu0 %v3512_v11 }
 0x3a3   :  { %v1222_v58 = vpop.f32.mrf.mxu0 }
 0x3a4   :  { %v4128_v59 = vadd.f32 %v2795_v8, %v1222_v58  ;;  %v1715_v8 = vld [vmem:[%s4477_s14 + $0x8] sm:$0xff]  ;;  %v1714_v58 = vld [vmem:[%s4477_s14] sm:$0xff] }
 0x3a5   :  { %v3183_v60 = vpop.f32.mrf.mxu0  ;;  %3241 = vmatpush3.msra.mxu0 %v1715_v8  ;;  %v2852_v8 = vld [vmem:[%s4477_s14 + $0x98] sm:$0xff] }
 0x3a6   :  { %v2805_v20 = vmul.f32 -1.442695, %v4128_v59  ;;  %3242 = vmatprep.subr.mxu0 %v3512_v11 }
 0x3a7   :  { %3243 = vmatpush3.msra.mxu0 %v1714_v58  ;;  %v2851_v58 = vld [vmem:[%s4477_s14 + $0x90] sm:$0xff] }
 0x3a8   :  { %3471 = vpow2.f32 %v2805_v20  ;;  %3247 = vmatprep.subr.mxu0 %v3512_v11 }
 0x3ab   :  { %v4134_v3 = vpop.f32.mrf.mxu0 }
 0x3ad   :  { %v3216_v4 = vpop.f32.mrf.mxu0 }
 0x3b5   :  { %v3472_v41 = vpop.eup %3471 }
 0x3b6   :  { %v1289_v49 = vadd.f32 1.0, %v3472_v41 }
 0x3b8   :  { %3473 = vrcp.f32 %v1289_v49 }
 0x3b9   :  { %3475 = vpow2.f32 %v2821_v6  ;;  %v2836_v6 = vld [vmem:[%s4477_s14 + $0x38] sm:$0xff] }
 0x3c5   :  { %v3474_v55 = vpop.eup %3473 }
 0x3c6   :  { %v1292_v38 = vmul.f32 %v3474_v55, %v4128_v59  ;;  %v3476_v9 = vpop.eup %3475  ;;  %v2835_v55 = vld [vmem:[%s4477_s14 + $0x30] sm:$0xff] }
 0x3c7   :  { %v1587_v12 = vadd.f32 1.0, %v3476_v9  ;;  %v2841_v9 = vld [vmem:[%s4477_s14 + $0x58] sm:$0xff] }
 0x3c8   :  { %3193 = vmatmul.mubr.msk.f32.vlgmr.msra.gmra.mxu1 %vm469_vm4, %v1292_v38  ;;  %v2834_v38 = vld [vmem:[%s4477_s14 + $0x28] sm:$0xff] }
 0x3c9   :  { %3196 = vmatpush3.msra.mxu1 %v1285_v7  ;;  %3203 = vmatprep.mubr.msk.f32.mxu1 %vm3513_vm1, %v3512_v11  ;;  %3477 = vrcp.f32 %v1587_v12  ;;  %v2833_v7 = vld [vmem:[%s4477_s14 + $0x20] sm:$0xff] }
 0x3ca   :  { %3197 = vmatprep.subr.mxu1 %v3512_v11 }
 0x3cb   :  { %3198 = vmatpush3.msra.mxu1 %v1284_v10  ;;  %v1689_v10 = vld [vmem:[%s4478_s15] sm:$0xf] }
 0x3cc   :  { %3199 = vmatprep.subr.mxu1 %v3512_v11  ;;  %v1721_v12 = vrot.slane %v1689_v10, %v3782_v35 }
 0x3cd   :  { %3200 = vmatpush3.msra.mxu1 %v1283_v2 }
 0x3ce   :  { %3201 = vmatprep.subr.mxu1 %v3512_v11 }
 0x3cf   :  { %3202 = vmatpush3.msra.mxu1 %v1282_v14 }
 0x3d0   :  { %3204 = vmatmul.mubr.msk.f32.vlgmr.msra.gmra.mxu1 %vm469_vm4, %v4040_v13  ;;  %3217 = vmatprep.subr.mxu1 %v3512_v11  ;;  %v2826_v13 = vld [vmem:[%s4472_s9 + $0x60] sm:$0xff]  ;;  %s3520_s9 = smov 32  }
 0x3d1   :  { %3218 = vmatpush3.msra.mxu1 %v2829_v61  ;;  %3233 = vmatprep.mubr.msk.f32.mxu1 %vm3513_vm1, %v3512_v11 }
 0x3d2   :  { %3219 = vmatprep.subr.mxu1 %v3512_v11 }
 0x3d3   :  { %3220 = vmatpush3.msra.mxu1 %v2828_v0 }
 0x3d4   :  { %3221 = vmatprep.subr.mxu1 %v3512_v11 }
 0x3d5   :  { %3222 = vmatpush3.msra.mxu1 %v2827_v15  ;;  %v2840_v15 = vld [vmem:[%s4477_s14 + $0x50] sm:$0xff] }
 0x3d6   :  { %3223 = vmatprep.subr.mxu1 %v3512_v11  ;;  %v3478_v40 = vpop.eup %3477 }
 0x3d7   :  { %3224 = vmatpush3.msra.mxu1 %v2826_v13  ;;  %v1590_v18 = vmul.f32 %v3478_v40, %v1583_v28  ;;  %v2839_v13 = vld [vmem:[%s4477_s14 + $0x48] sm:$0xff] }
 0x3d8   :  { %3225 = vmatprep.subr.mxu1 %v3512_v11 }
 0x3d9   :  { %3226 = vmatpush3.msra.mxu1 %v2825_v16  ;;  %v2838_v16 = vld [vmem:[%s4477_s14 + $0x40] sm:$0xff] }
 0x3da   :  { %3227 = vmatprep.subr.mxu1 %v3512_v11 }
 0x3db   :  { %3228 = vmatpush3.msra.mxu1 %v2824_v56  ;;  %v1806_v56 = vrot.slane %v1689_v10, %v3768_v26 }
 0x3dc   :  { %3229 = vmatprep.subr.mxu1 %v3512_v11 }
 0x3dd   :  { %3230 = vmatpush3.msra.mxu1 %v2823_v19 }
 0x3de   :  { %3231 = vmatprep.subr.mxu1 %v3512_v11 }
 0x3df   :  { %3232 = vmatpush3.msra.mxu1 %v2822_v22 }
 0x3e0   :  { %3234 = vmatmul.mubr.msk.f32.vlgmr.msra.gmra.mxu1 %vm270_vm3, %v1590_v18  ;;  %3258 = vmatprep.subr.mxu1 %v3512_v11 }
 0x3e1   :  { %3266 = vmatprep.mubr.msk.f32.mxu1 %vm3513_vm1, %v3512_v11  ;;  %3259 = vmatpush3.msra.mxu1 %v2841_v9  ;;  %v2863_v9 = vld [vmem:[%s4475_s12 + $0x40] sm:$0xff] }
 0x3e2   :  { %3260 = vmatprep.subr.mxu1 %v3512_v11 }
 0x3e3   :  { %3261 = vmatpush3.msra.mxu1 %v2840_v15 }
 0x3e4   :  { %3262 = vmatprep.subr.mxu1 %v3512_v11 }
 0x3e5   :  { %3263 = vmatpush3.msra.mxu1 %v2839_v13 }
 0x3e6   :  { %3264 = vmatprep.subr.mxu1 %v3512_v11 }
 0x3e7   :  { %3265 = vmatpush3.msra.mxu1 %v2838_v16 }
 0x3e8   :  { %3280 = vmatprep.subr.mxu1 %v3512_v11 }
 0x488   :  { %v1367_v21 = vpop.f32.mrf.mxu1 }
 0x48a   :  { %v3194_v17 = vpop.f32.mrf.mxu1 }
 0x48b   :  { %v1966_v17 = vrot.slane %v1689_v10, %v3789_v42 }
 0x490   :  { %v1468_v25 = vpop.f32.mrf.mxu1 }
 0x491   :  { %v1469_v24 = vadd.f32 %v1468_v25, %v1367_v21  ;;  %v1889_v21 = vrot.slane %v1689_v10, %v3778_v32  ;;  %v2872_v10 = vld [vmem:[%s4475_s12 + $0x78] sm:$0xff] }
 0x492   :  { %v3205_v29 = vpop.f32.mrf.mxu1 }
 0x493   :  { %v1557_v31 = vadd.f32 %v4134_v3, %v1469_v24 }
 0x495   :  { %v1563_v33 = vadd.f32 %v2818_v30, %v1557_v31 }
 0x497   :  { %1685 = vrot.lane.b32.xlu1 %v1563_v33, %s3520_s9  ;;  %v1678_v43 = vadd.f32 1.0, %v1563_v33 }
 0x4a0   :  { %v1674_v36 = vpop.f32.mrf.mxu1 }
 0x4a1   :  { %v1675_v37 = vadd.f32 %v2830_v34, %v1674_v36 }
 0x4a2   :  { %v3235_v39 = vpop.f32.mrf.mxu1 }
 0x4a3   :  { %1680 = vrot.lane.b32.xlu0 %v1675_v37, %s3520_s9 }
 0x509   :  { %v1686_v46 = vpop.permute.xlu1 %1685 }
 0x515   :  { %v1681_v44 = vpop.permute.xlu0 %1680 }
 0x516   :  { %v1683_v45 = vmul.f32 %v1681_v44, %v1678_v43  ;;  %v2847_v44 = vld [vmem:[%s4477_s14 + $0x78] sm:$0xff] }
 0x518   :  { %v1688_v47 = vadd.f32 %v1686_v46, %v1683_v45  ;;  %v2846_v45 = vld [vmem:[%s4477_s14 + $0x70] sm:$0xff]  ;;  %v2845_v46 = vld [vmem:[%s4477_s14 + $0x68] sm:$0xff] }
 0x51a   :  { %1691 = vrot.lane.b32.xlu1 %v1688_v47, %s3521_s23  ;;  %v1699_v48 = vmul.f32 %v1688_v47, %v1688_v47 }
 0x51e   :  { %1701 = vrot.lane.b32.xlu1 %v1699_v48, %s3521_s23 }
 0x58c   :  { %v1692_v50 = vpop.permute.xlu1 %1691 }
 0x58d   :  { %v1694_v51 = vsel %vm469_vm4, %v1692_v50, 0.0 }
 0x58e   :  { %1695 = vadd.xlane.f32.xlu1 %v1694_v51 }
 0x590   :  { %v1702_v52 = vpop.permute.xlu1 %1701 }
 0x591   :  { %v1704_v53 = vsel %vm469_vm4, %v1702_v52, 0.0 }
 0x592   :  { %1705 = vadd.xlane.f32.xlu0 %v1704_v53 }
 0x617   :  { %v1696_v60 = vpop.xlane.xlu1 %1695 }
 0x618   :  { %v1698_v20 = vmul.f32 0.03125, %v1696_v60 }
 0x61a   :  { %v1708_v1 = vmul.f32 %v1698_v20, %v1698_v20  ;;  %v1710_v5 = vsub.f32 %v1688_v47, %v1698_v20  ;;  %v2844_v47 = vld [vmem:[%s4477_s14 + $0x60] sm:$0xff] }
 0x61b   :  { %v1706_v62 = vpop.xlane.xlu0 %1705 }
 0x61c   :  { %v1707_v3 = vmul.f32 0.03125, %v1706_v62 }
 0x61e   :  { %v1709_v4 = vsub.f32 %v1707_v3, %v1708_v1  ;;  %v2850_v3 = vld [vmem:[%s4477_s14 + $0x88] sm:$0xff] }
 0x620   :  { %v1711_v63 = vadd.f32 1e-05, %v1709_v4  ;;  %v2849_v4 = vld [vmem:[%s4477_s14 + $0x80] sm:$0xff] }
 0x622   :  { %3479 = vrsqrt.f32 %v1711_v63  ;;  %v2857_v63 = vld [vmem:[%s4477_s14 + $0xb8] sm:$0xff] }
 0x62f   :  { %v3480_v28 = vpop.eup %3479 }
 0x630   :  { %v1713_v41 = vmul.f32 %v3480_v28, %v1710_v5  ;;  %v2843_v5 = vld [vmem:[%s4478_s15 + $0x4] sm:$0xf] }
 0x631   :  { %v2006_v28 = vrot.slane %v2843_v5, %v3782_v35  ;;  %v2864_v35 = vld [vmem:[%s4475_s12 + $0x48] sm:$0xff] }
 0x632   :  { %1723 = vrot.lane.b32.xlu1 %v1713_v41, %s3521_s23 }
 0x6a4   :  { %v1724_v49 = vpop.permute.xlu1 %1723 }
 0x6a5   :  { %3245 = vmatmul.mubr.msk.f32.vlgmr.msra.gmra.mxu0 %vm469_vm4, %v1724_v49 }
 0x6a6   :  { %3248 = vmatpush3.msra.mxu0 %v2836_v6  ;;  %3255 = vmatprep.mubr.msk.f32.mxu0 %vm3513_vm1, %v3512_v11 }
 0x6a7   :  { %3249 = vmatprep.subr.mxu0 %v3512_v11 }
 0x6a8   :  { %3250 = vmatpush3.msra.mxu0 %v2835_v55 }
 0x6a9   :  { %3251 = vmatprep.subr.mxu0 %v3512_v11 }
 0x6aa   :  { %3252 = vmatpush3.msra.mxu0 %v2834_v38  ;;  %v2866_v38 = vld [vmem:[%s4475_s12 + $0x58] sm:$0xff] }
 0x6ab   :  { %3253 = vmatprep.subr.mxu0 %v3512_v11 }
 0x6ac   :  { %3254 = vmatpush3.msra.mxu0 %v2833_v7  ;;  %v2865_v7 = vld [vmem:[%s4475_s12 + $0x50] sm:$0xff] }
 0x6ad   :  { %3269 = vmatprep.subr.mxu0 %v3512_v11 }
 0x765   :  { %v1793_v2 = vpop.f32.mrf.mxu0 }
 0x766   :  { %v1794_v14 = vadd.f32 %v1793_v2, %v1721_v12  ;;  %v2871_v12 = vld [vmem:[%s4475_s12 + $0x70] sm:$0xff]  ;;  %v2870_v2 = vld [vmem:[%s4475_s12 + $0x68] sm:$0xff] }
 0x767   :  { %v3246_v61 = vpop.f32.mrf.mxu0 }
 0x768   :  { %v1797_v0 = vmax.f32 %v1794_v14, 0.0  ;;  %v2856_v14 = vld [vmem:[%s4477_s14 + $0xb0] sm:$0xff]  ;;  %v2855_v61 = vld [vmem:[%s4477_s14 + $0xa8] sm:$0xff] }
 0x76a   :  { %3256 = vmatmul.mubr.msk.f32.vlgmr.msra.gmra.mxu0 %vm469_vm4, %v1797_v0  ;;  %v2091_v0 = vrot.slane %v2843_v5, %v3768_v26 }
 0x76b   :  { %3277 = vmatprep.mubr.msk.f32.mxu0 %vm3513_vm1, %v3512_v11  ;;  %3270 = vmatpush3.msra.mxu0 %v2847_v44  ;;  %v2859_v44 = vld [vmem:[%s4475_s12 + $0x20] sm:$0xff] }
 0x76c   :  { %3271 = vmatprep.subr.mxu0 %v3512_v11 }
 0x76d   :  { %3272 = vmatpush3.msra.mxu0 %v2846_v45 }
 0x76e   :  { %3273 = vmatprep.subr.mxu0 %v3512_v11 }
 0x76f   :  { %3274 = vmatpush3.msra.mxu0 %v2845_v46 }
 0x770   :  { %3275 = vmatprep.subr.mxu0 %v3512_v11 }
 0x771   :  { %3276 = vmatpush3.msra.mxu0 %v2844_v47 }
 0x772   :  { %3291 = vmatprep.subr.mxu0 %v3512_v11 }
 0x82a   :  { %v1876_v19 = vpop.f32.mrf.mxu0 }
 0x82b   :  { %v1877_v40 = vadd.f32 %v1876_v19, %v1806_v56 }
 0x82c   :  { %v3257_v22 = vpop.f32.mrf.mxu0 }
 0x82d   :  { %v1880_v18 = vmax.f32 %v1877_v40, 0.0 }
 0x82f   :  { %3267 = vmatmul.mubr.msk.f32.vlgmr.msra.gmra.mxu1 %vm469_vm4, %v1880_v18 }
 0x830   :  { %3288 = vmatprep.mubr.msk.f32.mxu1 %vm3513_vm1, %v3512_v11  ;;  %3281 = vmatpush3.msra.mxu1 %v2852_v8  ;;  %v2877_v8 = vld [vmem:[%s4475_s12 + $0x98] sm:$0xff] }
 0x831   :  { %3282 = vmatprep.subr.mxu1 %v3512_v11 }
 0x832   :  { %3283 = vmatpush3.msra.mxu1 %v2851_v58 }
 0x833   :  { %3284 = vmatprep.subr.mxu1 %v3512_v11 }
 0x834   :  { %3285 = vmatpush3.msra.mxu1 %v2850_v3  ;;  %v2633_v3 = vld [vmem:[%s4476_s13 + $0x10] sm:$0xff] }
 0x835   :  { %3286 = vmatprep.subr.mxu1 %v3512_v11 }
 0x836   :  { %3287 = vmatpush3.msra.mxu1 %v2849_v4  ;;  %v2632_v4 = vld [vmem:[%s4476_s13 + $0x8] sm:$0xff] }
 0x837   :  { %3302 = vmatprep.subr.mxu1 %v3512_v11 }
 0x8ef   :  { %v1959_v25 = vpop.f32.mrf.mxu1 }
 0x8f0   :  { %v1960_v24 = vadd.f32 %v1959_v25, %v1889_v21  ;;  %v2174_v21 = vrot.slane %v2843_v5, %v3778_v32 }
 0x8f1   :  { %v3268_v29 = vpop.f32.mrf.mxu1 }
 0x8f2   :  { %v1967_v30 = vmul.f32 %v1966_v17, %v1960_v24  ;;  %v2251_v17 = vrot.slane %v2843_v5, %v3789_v42 }
 0x8f4   :  { %1969 = vrot.lane.b32.xlu0 %v1967_v30, %s3520_s9 }
 0x966   :  { %v1970_v31 = vpop.permute.xlu0 %1969 }
 0x967   :  { %v1972_v33 = vadd.f32 %v1970_v31, %v1713_v41 }
 0x969   :  { %1976 = vrot.lane.b32.xlu1 %v1972_v33, %s3521_s23  ;;  %v1983_v34 = vmul.f32 %v1972_v33, %v1972_v33 }
 0x96d   :  { %1985 = vrot.lane.b32.xlu1 %v1983_v34, %s3521_s23 }
 0x9db   :  { %v1977_v36 = vpop.permute.xlu1 %1976 }
 0x9dc   :  { %v1979_v37 = vsel %vm469_vm4, %v1977_v36, 0.0 }
 0x9dd   :  { %1980 = vadd.xlane.f32.xlu1 %v1979_v37  ;;  %v2862_v37 = vld [vmem:[%s4475_s12 + $0x38] sm:$0xff] }
 0x9df   :  { %v1986_v39 = vpop.permute.xlu1 %1985 }
 0x9e0   :  { %v1988_v43 = vsel %vm469_vm4, %v1986_v39, 0.0  ;;  %v2861_v39 = vld [vmem:[%s4475_s12 + $0x30] sm:$0xff] }
 0x9e1   :  { %1989 = vadd.xlane.f32.xlu0 %v1988_v43  ;;  %v2860_v43 = vld [vmem:[%s4475_s12 + $0x28] sm:$0xff] }
 0xa66   :  { %v1981_v48 = vpop.xlane.xlu1 %1980 }
 0xa67   :  { %v1982_v50 = vmul.f32 0.03125, %v1981_v48 }
 0xa69   :  { %v1992_v52 = vmul.f32 %v1982_v50, %v1982_v50  ;;  %v1994_v60 = vsub.f32 %v1972_v33, %v1982_v50 }
 0xa6a   :  { %v1990_v51 = vpop.xlane.xlu0 %1989 }
 0xa6b   :  { %v1991_v53 = vmul.f32 0.03125, %v1990_v51 }
 0xa6d   :  { %v1993_v54 = vsub.f32 %v1991_v53, %v1992_v52 }
 0xa6f   :  { %v1995_v57 = vadd.f32 1e-05, %v1993_v54 }
 0xa71   :  { %3481 = vrsqrt.f32 %v1995_v57 }
 0xa7e   :  { %v3482_v20 = vpop.eup %3481 }
 0xa7f   :  { %v4305_v62 = vmul.f32 %v3482_v20, %v1994_v60  ;;  %v2876_v60 = vld [vmem:[%s4475_s12 + $0x90] sm:$0xff]  ;;  %v2875_v20 = vld [vmem:[%s4475_s12 + $0x88] sm:$0xff] }
 0xa81   :  { %2008 = vrot.lane.b32.xlu0 %v4305_v62, %s3521_s23 }
 0xaf3   :  { %v2009_v1 = vpop.permute.xlu0 %2008 }
 0xaf4   :  { %3278 = vmatmul.mubr.msk.f32.vlgmr.msra.gmra.mxu0 %vm469_vm4, %v2009_v1  ;;  %v2634_v1 = vld [vmem:[%s4476_s13 + $0x18] sm:$0xff] }
 0xaf5   :  { %3299 = vmatprep.mubr.msk.f32.mxu0 %vm3513_vm1, %v3512_v11  ;;  %3292 = vmatpush3.msra.mxu0 %v2857_v63 }
 0xaf6   :  { %3293 = vmatprep.subr.mxu0 %v3512_v11 }
 0xaf7   :  { %3294 = vmatpush3.msra.mxu0 %v2856_v14 }
 0xaf8   :  { %3295 = vmatprep.subr.mxu0 %v3512_v11 }
 0xaf9   :  { %3296 = vmatpush3.msra.mxu0 %v2855_v61 }
 0xafa   :  { %3297 = vmatprep.subr.mxu0 %v3512_v11 }
 0xbb4   :  { %v2078_v41 = vpop.f32.mrf.mxu0 }
 0xbb5   :  { %v2079_v6 = vadd.f32 %v2078_v41, %v2006_v28 }
 0xbb6   :  { %v3279_v49 = vpop.f32.mrf.mxu0 }
 0xbb7   :  { %v2082_v55 = vmax.f32 %v2079_v6, 0.0  ;;  %v2879_v49 = vld [vmem:[%s4479_s16 + $0x9] ss:$0 sm:$0xff] }
 0xbb9   :  { %3289 = vmatmul.mubr.msk.f32.vlgmr.msra.gmra.mxu1 %vm469_vm4, %v2082_v55 }
 0xbba   :  { %3303 = vmatpush3.msra.mxu1 %v2866_v38  ;;  %3310 = vmatprep.mubr.msk.f32.mxu1 %vm3513_vm1, %v3512_v11 }
 0xbbb   :  { %3304 = vmatprep.subr.mxu1 %v3512_v11 }
 0xbbc   :  { %3305 = vmatpush3.msra.mxu1 %v2865_v7 }
 0xbbd   :  { %3306 = vmatprep.subr.mxu1 %v3512_v11 }
 0xbbe   :  { %3307 = vmatpush3.msra.mxu1 %v2864_v35 }
 0xbbf   :  { %3308 = vmatprep.subr.mxu1 %v3512_v11 }
 0xbc0   :  { %3309 = vmatpush3.msra.mxu1 %v2863_v9 }
 0xbc1   :  { %3311 = vmatmul.mubr.msk.f32.vlgmr.msra.gmra.mxu1 %vm469_vm4, %v4010_v23  ;;  %3324 = vmatprep.subr.mxu1 %v3512_v11  ;;  %v2869_v23 = vld [vmem:[%s4475_s12 + $0x60] sm:$0xff] }
 0xbc2   :  { %3325 = vmatpush3.msra.mxu1 %v2872_v10  ;;  %3332 = vmatprep.mubr.msk.f32.mxu1 %vm3513_vm1, %v3512_v11 }
 0xbc3   :  { %3326 = vmatprep.subr.mxu1 %v3512_v11 }
 0xbc4   :  { %3327 = vmatpush3.msra.mxu1 %v2871_v12 }
 0xbc5   :  { %3328 = vmatprep.subr.mxu1 %v3512_v11 }
 0xbc6   :  { %3329 = vmatpush3.msra.mxu1 %v2870_v2  ;;  %v2881_v2 = vld [vmem:[%s4479_s16 + $0xa] ss:$0 sm:$0xff] }
 0xbc7   :  { %3330 = vmatprep.subr.mxu1 %v3512_v11 }
 0xbc8   :  { %3331 = vmatpush3.msra.mxu1 %v2869_v23 }
 0xbc9   :  { %3333 = vmatmul.mubr.msk.f32.vlgmr.msra.gmra.mxu1 %vm469_vm4, %v4128_v59  ;;  %3346 = vmatprep.subr.mxu1 %v3512_v11  ;;  %v2854_v59 = vld [vmem:[%s4477_s14 + $0xa0] sm:$0xff]  ;;  %s2720_s14 = sshll.u32 %s3522_s7, 4  ;;  %s2721_s14 = int_to_ptr.vmem [resolvable:$true] %s2720_s14 }
 0xbca   :  { %3354 = vmatprep.mubr.msk.f32.mxu1 %vm3513_vm1, %v3512_v11  ;;  %3298 = vmatpush3.msra.mxu0 %v2854_v59  ;;  %s3489_s3 = scalar_lea.vmem %s2721_s14, 128  ;;  %p3494_p1 = scmp.lt.s32.totalorder %s2721_s14, %s2721_s14 }
 0xbcb   :  { %3313 = vmatprep.subr.mxu0 %v3512_v11  ;;  %3347 = vmatpush3.msra.mxu1 %v2634_v1  ;;  %p3490_p0 = scmp.ne.s32.totalorder %s2721_s14, %s3489_s3  ;;  %p3495_p2 = scmp.lt.s32.totalorder %s3489_s3, %s3489_s3 }
 0xbcc   :  { %3348 = vmatprep.subr.mxu1 %v3512_v11 }
 0xbcd   :  { %3349 = vmatpush3.msra.mxu1 %v2633_v3  ;;  %p3496_p3 = por %p3495_p2, %p3494_p1 }
 0xbce   :  { %3350 = vmatprep.subr.mxu1 %v3512_v11 }
 0xbcf   :  { %3351 = vmatpush3.msra.mxu1 %v2632_v4  ;;  %p3497_p4 = pnand %p3496_p3, %p3490_p0 }
 0xbd0   :  { %3352 = vmatprep.subr.mxu1 %v3512_v11 }
 0xc79   :  { %v2161_v15 = vpop.f32.mrf.mxu1 }
 0xc7a   :  { %v2162_v13 = vadd.f32 %v2161_v15, %v2091_v0 }
 0xc7b   :  { %v3290_v16 = vpop.f32.mrf.mxu1 }
 0xc7c   :  { %v2165_v56 = vmax.f32 %v2162_v13, 0.0 }
 0xc7e   :  { %3300 = vmatmul.mubr.msk.f32.vlgmr.msra.gmra.mxu0 %vm469_vm4, %v2165_v56 }
 0xc7f   :  { %3321 = vmatprep.mubr.msk.f32.mxu0 %vm3513_vm1, %v3512_v11  ;;  %3314 = vmatpush3.msra.mxu0 %v2862_v37 }
 0xc80   :  { %3315 = vmatprep.subr.mxu0 %v3512_v11 }
 0xc81   :  { %v4387_v19 = vpop.f32.mrf.mxu1  ;;  %3316 = vmatpush3.msra.mxu0 %v2861_v39 }
 0xc82   :  { %3317 = vmatprep.subr.mxu0 %v3512_v11 }
 0xc83   :  { %v3312_v40 = vpop.f32.mrf.mxu1  ;;  %3318 = vmatpush3.msra.mxu0 %v2860_v43 }
 0xc84   :  { %3319 = vmatprep.subr.mxu0 %v3512_v11 }
 0xc85   :  { %3320 = vmatpush3.msra.mxu0 %v2859_v44 }
 0xc86   :  { %3335 = vmatprep.subr.mxu0 %v3512_v11 }
 0xc89   :  { %v4389_v22 = vpop.f32.mrf.mxu1 }
 0xc8b   :  { %v3334_v18 = vpop.f32.mrf.mxu1 }
 0xd3e   :  { %v2244_v26 = vpop.f32.mrf.mxu0 }
 0xd3f   :  { %v2245_v25 = vadd.f32 %v2244_v26, %v2174_v21 }
 0xd40   :  { %v3301_v24 = vpop.f32.mrf.mxu0 }
 0xd41   :  { %v2252_v29 = vmul.f32 %v2251_v17, %v2245_v25 }
 0xd43   :  { %2254 = vrot.lane.b32.xlu1 %v2252_v29, %s3520_s9 }
 0xdb5   :  { %v2255_v30 = vpop.permute.xlu1 %2254 }
 0xdb6   :  { %v2257_v31 = vadd.f32 %v2255_v30, %v4305_v62  ;;  %v2874_v62 = vld [vmem:[%s4475_s12 + $0x80] sm:$0xff] }
 0xdb8   :  { %2259 = vrot.lane.b32.xlu1 %v2257_v31, %s3521_s23  ;;  %v2266_v33 = vmul.f32 %v2257_v31, %v2257_v31 }
 0xdba   :  { %2268 = vrot.lane.b32.xlu0 %v2266_v33, %s3521_s23 }
 0xe2a   :  { %v2260_v34 = vpop.permute.xlu1 %2259 }
 0xe2b   :  { %v2262_v36 = vsel %vm469_vm4, %v2260_v34, 0.0 }
 0xe2c   :  { %2263 = vadd.xlane.f32.xlu1 %v2262_v36  ;;  %v2269_v32 = vpop.permute.xlu0 %2268 }
 0xe2d   :  { %v2271_v42 = vsel %vm469_vm4, %v2269_v32, 0.0 }
 0xe2e   :  { %2272 = vadd.xlane.f32.xlu0 %v2271_v42 }
 0xeb5   :  { %v2264_v45 = vpop.xlane.xlu1 %2263 }
 0xeb6   :  { %v2265_v46 = vmul.f32 0.03125, %v2264_v45 }
 0xeb7   :  { %v2273_v47 = vpop.xlane.xlu0 %2272 }
 0xeb8   :  { %v2275_v48 = vmul.f32 %v2265_v46, %v2265_v46  ;;  %v2274_v50 = vmul.f32 0.03125, %v2273_v47  ;;  %v2277_v53 = vsub.f32 %v2257_v31, %v2265_v46 }
 0xeba   :  { %v2276_v51 = vsub.f32 %v2274_v50, %v2275_v48 }
 0xebc   :  { %v2278_v52 = vadd.f32 1e-05, %v2276_v51 }
 0xebe   :  { %3483 = vrsqrt.f32 %v2278_v52 }
 0xecb   :  { %v3484_v54 = vpop.eup %3483 }
 0xecc   :  { %v2280_v57 = vmul.f32 %v3484_v54, %v2277_v53 }
 0xece   :  { %2386 = vrot.lane.b32.xlu0 %v2280_v57, %s3521_s23 }
 0xf40   :  { %v2387_v58 = vpop.permute.xlu0 %2386 }
 0xf41   :  { %3322 = vmatmul.mubr.msk.f32.vlgmr.msra.gmra.mxu0 %vm469_vm4, %v2387_v58 }
 0xf42   :  { %3336 = vmatpush3.msra.mxu0 %v2877_v8  ;;  %3343 = vmatprep.mubr.msk.f32.mxu0 %vm3513_vm1, %v3512_v11 }
 0xf43   :  { %3337 = vmatprep.subr.mxu0 %v3512_v11 }
 0xf44   :  { %3338 = vmatpush3.msra.mxu0 %v2876_v60 }
 0xf45   :  { %3339 = vmatprep.subr.mxu0 %v3512_v11 }
 0xf46   :  { %3340 = vmatpush3.msra.mxu0 %v2875_v20 }
 0xf47   :  { %3341 = vmatprep.subr.mxu0 %v3512_v11 }
 0xf48   :  { %3342 = vmatpush3.msra.mxu0 %v2874_v62 }
 0xf49   :  { %3344 = vmatmul.mubr.msk.f32.vlgmr.msra.gmra.mxu0 %vm469_vm4, %v4083_v27  ;;  %v2631_v27 = vld [vmem:[%s4476_s13] sm:$0xff] }
 0xf4a   :  { %3353 = vmatpush3.msra.mxu1 %v2631_v27 }
0x1001   :  { %v2456_v63 = vpop.f32.mrf.mxu0 }
0x1002   :  { %v2457_v28 = vadd.f32 %v2456_v63, %v4387_v19 }
0x1003   :  { %v3323_v5 = vpop.f32.mrf.mxu0 }
0x1004   :  { %v2538_v41 = vadd.f32 %v4389_v22, %v2457_v28 }
0x1009   :  { %v2613_v6 = vpop.f32.mrf.mxu0 }
0x100a   :  { %v2617_v55 = vadd.f32 %v2613_v6, %v2538_v41 }
0x100b   :  { %v3345_v38 = vpop.f32.mrf.mxu0 }
0x100c   :  { %v2623_v7 = vadd.f32 %v2879_v49, %v2617_v55 }
0x100e   :  { %v2880_v35 = vmul.f32 -1.442695, %v2623_v7 }
0x1010   :  { %3485 = vpow2.f32 %v2880_v35 }
0x101d   :  { %v3486_v9 = vpop.eup %3485 }
0x101e   :  { %v2627_v10 = vadd.f32 1.0, %v3486_v9 }
0x1020   :  { %3487 = vrcp.f32 %v2627_v10 }
0x102d   :  { %v3488_v11 = vpop.eup %3487 }
0x102e   :  { %v2630_v12 = vmul.f32 %v3488_v11, %v2623_v7 }
0x1030   :  { %3355 = vmatmul.mubr.msk.f32.vlgmr.msra.gmra.mxu1 %vm469_vm4, %v2630_v12 }
0x10f0   :  { %v2709_v23 = vpop.f32.mrf.mxu1 }
0x10f1   :  { %v2710_v14 = vadd.f32 %v2881_v2, %v2709_v23 }
0x10f2   :  { %v3356_v61 = vpop.f32.mrf.mxu1 }
0x10f3   :  { %2713 = vst [vmem:[#allocation2] sm:$0xff] %v2710_v14 }
0x10f4   :  { %3500 = shalt.err (!%p3497_p4)
}
0x10f5   :  { %2723 = dma.vmem_to_hbm [thread:$0]  %s2721_s14, 128, %s4480_s17, [#allocation3]  }
0x10f6   :  { %3509 = dma.done.wait [#allocation3], 128  }
0x10f7   :  { %3510 = vsyncadd [#allocation3], 4294967168 }
0x10f8   :  { %2727 = vsyncpa [#allocation3], 1 }

</bundles_post_ra>
